<compile_context>
chip_gen: v5e
topology: v5e:2x2
jax: 0.10.0
libtpu: 0.0.40
codegen_flags: <defaults>
</compile_context>

<pallas_src>
import functools

import jax
import jax.numpy as jnp
from jax.experimental import pallas as pl
from jax.experimental.pallas import tpu as pltpu

# Module / example dimensions (small, deterministic)
IN_FEAT = 4
OUT_FEAT = 8
K = 3          # kernel size (module default)
PAD = 1        # padding     (module default)
STRIDE = 1     # stride      (module default)
H = W = 16
BATCH = 2
LANE = 128


def _round_up(x, m):
    return (x + m - 1) // m * m


def conv_bn_relu_kernel(x_ref, w_ref, b_ref, o_ref):
    # x_ref: [1, H+2, W+2, Kp]  spatially zero-padded, channel-padded NHWC input
    # w_ref: [9, Kp, Np]        per-tap folded (conv * BN-scale) weights
    # b_ref: [1, Np]            folded BN shift
    # o_ref: [1, H, W, Np]      lane-dense padded output
    h = o_ref.shape[1]
    w = o_ref.shape[2]
    np_ = o_ref.shape[3]

    x = x_ref[0]                                   # [Hp, Wp, Kp]
    acc = jnp.zeros((h, w, np_), jnp.float32)
    for tap in range(K * K):                       # 9 static taps, unrolled
        dy, dx = tap // K, tap % K
        window = x[dy:dy + h, dx:dx + w, :]        # [H, W, Kp]
        acc = acc + jax.lax.dot_general(
            window, w_ref[tap],
            dimension_numbers=(((2,), (0,)), ((), ())),
            preferred_element_type=jnp.float32)
    out = jnp.maximum(acc + b_ref[...], 0.0)       # f32 bias + ReLU epilogue
    o_ref[0] = out.astype(o_ref.dtype)


def fold_and_pad_params(conv_w, gamma, beta, mean, var, eps=1e-5):
    """Fold inference-mode BN into conv weight/bias and pad channel dims to the
    128-lane width. Done once at init, NOT per forward call."""
    c_out, c_in, kh, kw = conv_w.shape
    scale = gamma * jax.lax.rsqrt(var + eps)                  # [C_out]
    w_folded = conv_w * scale[:, None, None, None]            # [C_out, C_in, 3, 3]
    b_folded = beta - mean * scale                            # [C_out]

    kp = _round_up(c_in, LANE)
    np_ = _round_up(c_out, LANE)

    # [C_out, C_in, ky, kx] -> [ky*kx, C_in, C_out], zero-pad to [9, Kp, Np]
    w_taps = jnp.transpose(w_folded, (2, 3, 1, 0)).reshape(kh * kw, c_in, c_out)
    w_taps = jnp.pad(w_taps, ((0, 0), (0, kp - c_in), (0, np_ - c_out)))
    b_pad = jnp.pad(b_folded, (0, np_ - c_out)).reshape(1, np_)
    return w_taps, b_pad, kp, np_


@functools.partial(jax.jit, static_argnames=("kp", "np_"))
def conv_block_forward(x_nchw, w_taps, b_pad, kp, np_):
    b, c_in, h, w = x_nchw.shape
    c_out = OUT_FEAT

    # NCHW -> NHWC, zero-pad spatial (p=1) and channels (to Kp lanes).
    x = jnp.transpose(x_nchw, (0, 2, 3, 1))
    x = jnp.pad(x, ((0, 0), (PAD, PAD), (PAD, PAD), (0, kp - c_in)))
    hp, wp = h + 2 * PAD, w + 2 * PAD

    out = pl.pallas_call(
        conv_bn_relu_kernel,
        out_shape=jax.ShapeDtypeStruct((b, h, w, np_), jnp.float32),
        grid=(b,),
        in_specs=[
            pl.BlockSpec((1, hp, wp, kp), lambda i: (i, 0, 0, 0)),
            pl.BlockSpec((K * K, kp, np_), lambda i: (0, 0, 0)),   # weights stay resident
            pl.BlockSpec((1, np_), lambda i: (0, 0)),              # bias stays resident
        ],
        out_specs=pl.BlockSpec((1, h, w, np_), lambda i: (i, 0, 0, 0)),
        compiler_params=pltpu.CompilerParams(
            dimension_semantics=("parallel",)),
    )(x, w_taps, b_pad)

    out = out[:, :, :, :c_out]                # drop lane padding
    return jnp.transpose(out, (0, 3, 1, 2))   # back to NCHW


if __name__ == "__main__":
    key = jax.random.PRNGKey(0)
    kx, kw, kg, kb, km, kv = jax.random.split(key, 6)

    x = jax.random.normal(kx, (BATCH, IN_FEAT, H, W), dtype=jnp.float32)
    conv_w = jax.random.normal(kw, (OUT_FEAT, IN_FEAT, K, K), dtype=jnp.float32) * 0.1
    gamma = jax.random.uniform(kg, (OUT_FEAT,), minval=0.5, maxval=1.5, dtype=jnp.float32)
    beta = jax.random.normal(kb, (OUT_FEAT,), dtype=jnp.float32) * 0.1
    mean = jax.random.normal(km, (OUT_FEAT,), dtype=jnp.float32) * 0.1
    var = jax.random.uniform(kv, (OUT_FEAT,), minval=0.5, maxval=1.5, dtype=jnp.float32)

    # TODO(synk): BatchNorm training-mode batch statistics (and running-stat
    # updates) are not implemented; BN is folded in inference mode.
    w_taps, b_pad, kp, np_ = fold_and_pad_params(conv_w, gamma, beta, mean, var)

    out = conv_block_forward(x, w_taps, b_pad, kp, np_)
    out = jax.block_until_ready(out)

    # plain-JAX reference: conv (no bias) -> BN (inference) -> ReLU
    ref = jax.lax.conv_general_dilated(
        x, conv_w, window_strides=(STRIDE, STRIDE),
        padding=((PAD, PAD), (PAD, PAD)),
        dimension_numbers=("NCHW", "OIHW", "NCHW"))
    scale = gamma * jax.lax.rsqrt(var + 1e-5)
    shift = beta - mean * scale
    ref = jnp.maximum(ref * scale[None, :, None, None] + shift[None, :, None, None], 0.0)

    assert out.shape == (BATCH, OUT_FEAT, H, W)
    assert jnp.allclose(out, ref, atol=1e-4, rtol=1e-4)

    print("KERNEL_OK")
</pallas_src>

<mosaic_0001>
module attributes {stable_mosaic.version = 11 : i64} {
  func.func @conv_bn_relu_kernel(%arg0: i32, %arg1: memref<1x18x18x128xf32, #tpu.memory_space<vmem>>, %arg2: memref<9x128x128xf32, #tpu.memory_space<vmem>>, %arg3: memref<1x128xf32, #tpu.memory_space<vmem>>, %arg4: memref<1x16x16x128xf32, #tpu.memory_space<vmem>>) attributes {dimension_semantics = [#tpu.dimension_semantics<parallel>], iteration_bounds = array<i64: 2>, scalar_prefetch = 0 : i64, scratch_operands = 0 : i64, tpu.core_type = #tpu.core_type<tc>, window_params = [{transform_indices = @transform_0, window_bounds = array<i64: 1, 18, 18, 128>}, {pipeline_mode = #tpu.pipeline_mode<synchronous>, transform_indices = @transform_1, window_bounds = array<i64: 9, 128, 128>}, {pipeline_mode = #tpu.pipeline_mode<synchronous>, transform_indices = @transform_2, window_bounds = array<i64: 1, 128>}, {transform_indices = @transform_3, window_bounds = array<i64: 1, 16, 16, 128>}]} {
    %c0 = arith.constant 0 : index
    %c0_0 = arith.constant 0 : index
    %c0_1 = arith.constant 0 : index
    %c0_2 = arith.constant 0 : index
    %0 = vector.load %arg1[%c0, %c0_0, %c0_1, %c0_2] : memref<1x18x18x128xf32, #tpu.memory_space<vmem>>, vector<1x18x18x128xf32>
    %1 = vector.shape_cast %0 : vector<1x18x18x128xf32> to vector<18x18x128xf32>
    %cst = arith.constant 0.000000e+00 : f32
    %2 = vector.broadcast %cst : f32 to vector<16x16x128xf32>
    %3 = vector.extract_strided_slice %1 {offsets = [0, 0, 0], sizes = [16, 16, 128], strides = [1, 1, 1]} : vector<18x18x128xf32> to vector<16x16x128xf32>
    %c0_3 = arith.constant 0 : index
    %c0_4 = arith.constant 0 : index
    %c0_5 = arith.constant 0 : index
    %4 = vector.load %arg2[%c0_3, %c0_4, %c0_5] : memref<9x128x128xf32, #tpu.memory_space<vmem>>, vector<1x128x128xf32>
    %5 = vector.shape_cast %4 : vector<1x128x128xf32> to vector<128x128xf32>
    %cst_6 = arith.constant dense<0.000000e+00> : vector<16x16x128xf32>
    %6 = tpu.matmul %3, %5, %cst_6 {dimension_numbers = #tpu.dot_dimension_numbers<[2], [0], [0, 1], [1], [0, 0, 0, 1, 1, 1], [], []>} : vector<16x16x128xf32>, vector<128x128xf32>, vector<16x16x128xf32> -> vector<16x16x128xf32>
    %7 = arith.addf %2, %6 : vector<16x16x128xf32>
    %8 = vector.extract_strided_slice %1 {offsets = [0, 1, 0], sizes = [16, 16, 128], strides = [1, 1, 1]} : vector<18x18x128xf32> to vector<16x16x128xf32>
    %c1 = arith.constant 1 : index
    %c0_7 = arith.constant 0 : index
    %c0_8 = arith.constant 0 : index
    %9 = vector.load %arg2[%c1, %c0_7, %c0_8] : memref<9x128x128xf32, #tpu.memory_space<vmem>>, vector<1x128x128xf32>
    %10 = vector.shape_cast %9 : vector<1x128x128xf32> to vector<128x128xf32>
    %cst_9 = arith.constant dense<0.000000e+00> : vector<16x16x128xf32>
    %11 = tpu.matmul %8, %10, %cst_9 {dimension_numbers = #tpu.dot_dimension_numbers<[2], [0], [0, 1], [1], [0, 0, 0, 1, 1, 1], [], []>} : vector<16x16x128xf32>, vector<128x128xf32>, vector<16x16x128xf32> -> vector<16x16x128xf32>
    %12 = arith.addf %7, %11 : vector<16x16x128xf32>
    %13 = vector.extract_strided_slice %1 {offsets = [0, 2, 0], sizes = [16, 16, 128], strides = [1, 1, 1]} : vector<18x18x128xf32> to vector<16x16x128xf32>
    %c2 = arith.constant 2 : index
    %c0_10 = arith.constant 0 : index
    %c0_11 = arith.constant 0 : index
    %14 = vector.load %arg2[%c2, %c0_10, %c0_11] : memref<9x128x128xf32, #tpu.memory_space<vmem>>, vector<1x128x128xf32>
    %15 = vector.shape_cast %14 : vector<1x128x128xf32> to vector<128x128xf32>
    %cst_12 = arith.constant dense<0.000000e+00> : vector<16x16x128xf32>
    %16 = tpu.matmul %13, %15, %cst_12 {dimension_numbers = #tpu.dot_dimension_numbers<[2], [0], [0, 1], [1], [0, 0, 0, 1, 1, 1], [], []>} : vector<16x16x128xf32>, vector<128x128xf32>, vector<16x16x128xf32> -> vector<16x16x128xf32>
    %17 = arith.addf %12, %16 : vector<16x16x128xf32>
    %18 = vector.extract_strided_slice %1 {offsets = [1, 0, 0], sizes = [16, 16, 128], strides = [1, 1, 1]} : vector<18x18x128xf32> to vector<16x16x128xf32>
    %c3 = arith.constant 3 : index
    %c0_13 = arith.constant 0 : index
    %c0_14 = arith.constant 0 : index
    %19 = vector.load %arg2[%c3, %c0_13, %c0_14] : memref<9x128x128xf32, #tpu.memory_space<vmem>>, vector<1x128x128xf32>
    %20 = vector.shape_cast %19 : vector<1x128x128xf32> to vector<128x128xf32>
    %cst_15 = arith.constant dense<0.000000e+00> : vector<16x16x128xf32>
    %21 = tpu.matmul %18, %20, %cst_15 {dimension_numbers = #tpu.dot_dimension_numbers<[2], [0], [0, 1], [1], [0, 0, 0, 1, 1, 1], [], []>} : vector<16x16x128xf32>, vector<128x128xf32>, vector<16x16x128xf32> -> vector<16x16x128xf32>
    %22 = arith.addf %17, %21 : vector<16x16x128xf32>
    %23 = vector.extract_strided_slice %1 {offsets = [1, 1, 0], sizes = [16, 16, 128], strides = [1, 1, 1]} : vector<18x18x128xf32> to vector<16x16x128xf32>
    %c4 = arith.constant 4 : index
    %c0_16 = arith.constant 0 : index
    %c0_17 = arith.constant 0 : index
    %24 = vector.load %arg2[%c4, %c0_16, %c0_17] : memref<9x128x128xf32, #tpu.memory_space<vmem>>, vector<1x128x128xf32>
    %25 = vector.shape_cast %24 : vector<1x128x128xf32> to vector<128x128xf32>
    %cst_18 = arith.constant dense<0.000000e+00> : vector<16x16x128xf32>
    %26 = tpu.matmul %23, %25, %cst_18 {dimension_numbers = #tpu.dot_dimension_numbers<[2], [0], [0, 1], [1], [0, 0, 0, 1, 1, 1], [], []>} : vector<16x16x128xf32>, vector<128x128xf32>, vector<16x16x128xf32> -> vector<16x16x128xf32>
    %27 = arith.addf %22, %26 : vector<16x16x128xf32>
    %28 = vector.extract_strided_slice %1 {offsets = [1, 2, 0], sizes = [16, 16, 128], strides = [1, 1, 1]} : vector<18x18x128xf32> to vector<16x16x128xf32>
    %c5 = arith.constant 5 : index
    %c0_19 = arith.constant 0 : index
    %c0_20 = arith.constant 0 : index
    %29 = vector.load %arg2[%c5, %c0_19, %c0_20] : memref<9x128x128xf32, #tpu.memory_space<vmem>>, vector<1x128x128xf32>
    %30 = vector.shape_cast %29 : vector<1x128x128xf32> to vector<128x128xf32>
    %cst_21 = arith.constant dense<0.000000e+00> : vector<16x16x128xf32>
    %31 = tpu.matmul %28, %30, %cst_21 {dimension_numbers = #tpu.dot_dimension_numbers<[2], [0], [0, 1], [1], [0, 0, 0, 1, 1, 1], [], []>} : vector<16x16x128xf32>, vector<128x128xf32>, vector<16x16x128xf32> -> vector<16x16x128xf32>
    %32 = arith.addf %27, %31 : vector<16x16x128xf32>
    %33 = vector.extract_strided_slice %1 {offsets = [2, 0, 0], sizes = [16, 16, 128], strides = [1, 1, 1]} : vector<18x18x128xf32> to vector<16x16x128xf32>
    %c6 = arith.constant 6 : index
    %c0_22 = arith.constant 0 : index
    %c0_23 = arith.constant 0 : index
    %34 = vector.load %arg2[%c6, %c0_22, %c0_23] : memref<9x128x128xf32, #tpu.memory_space<vmem>>, vector<1x128x128xf32>
    %35 = vector.shape_cast %34 : vector<1x128x128xf32> to vector<128x128xf32>
    %cst_24 = arith.constant dense<0.000000e+00> : vector<16x16x128xf32>
    %36 = tpu.matmul %33, %35, %cst_24 {dimension_numbers = #tpu.dot_dimension_numbers<[2], [0], [0, 1], [1], [0, 0, 0, 1, 1, 1], [], []>} : vector<16x16x128xf32>, vector<128x128xf32>, vector<16x16x128xf32> -> vector<16x16x128xf32>
    %37 = arith.addf %32, %36 : vector<16x16x128xf32>
    %38 = vector.extract_strided_slice %1 {offsets = [2, 1, 0], sizes = [16, 16, 128], strides = [1, 1, 1]} : vector<18x18x128xf32> to vector<16x16x128xf32>
    %c7 = arith.constant 7 : index
    %c0_25 = arith.constant 0 : index
    %c0_26 = arith.constant 0 : index
    %39 = vector.load %arg2[%c7, %c0_25, %c0_26] : memref<9x128x128xf32, #tpu.memory_space<vmem>>, vector<1x128x128xf32>
    %40 = vector.shape_cast %39 : vector<1x128x128xf32> to vector<128x128xf32>
    %cst_27 = arith.constant dense<0.000000e+00> : vector<16x16x128xf32>
    %41 = tpu.matmul %38, %40, %cst_27 {dimension_numbers = #tpu.dot_dimension_numbers<[2], [0], [0, 1], [1], [0, 0, 0, 1, 1, 1], [], []>} : vector<16x16x128xf32>, vector<128x128xf32>, vector<16x16x128xf32> -> vector<16x16x128xf32>
    %42 = arith.addf %37, %41 : vector<16x16x128xf32>
    %43 = vector.extract_strided_slice %1 {offsets = [2, 2, 0], sizes = [16, 16, 128], strides = [1, 1, 1]} : vector<18x18x128xf32> to vector<16x16x128xf32>
    %c8 = arith.constant 8 : index
    %c0_28 = arith.constant 0 : index
    %c0_29 = arith.constant 0 : index
    %44 = vector.load %arg2[%c8, %c0_28, %c0_29] : memref<9x128x128xf32, #tpu.memory_space<vmem>>, vector<1x128x128xf32>
    %45 = vector.shape_cast %44 : vector<1x128x128xf32> to vector<128x128xf32>
    %cst_30 = arith.constant dense<0.000000e+00> : vector<16x16x128xf32>
    %46 = tpu.matmul %43, %45, %cst_30 {dimension_numbers = #tpu.dot_dimension_numbers<[2], [0], [0, 1], [1], [0, 0, 0, 1, 1, 1], [], []>} : vector<16x16x128xf32>, vector<128x128xf32>, vector<16x16x128xf32> -> vector<16x16x128xf32>
    %47 = arith.addf %42, %46 : vector<16x16x128xf32>
    %c0_31 = arith.constant 0 : index
    %c0_32 = arith.constant 0 : index
    %48 = vector.load %arg3[%c0_31, %c0_32] : memref<1x128xf32, #tpu.memory_space<vmem>>, vector<1x128xf32>
    %49 = vector.shape_cast %48 : vector<1x128xf32> to vector<1x1x128xf32>
    %50 = vector.broadcast %49 : vector<1x1x128xf32> to vector<16x16x128xf32>
    %51 = arith.addf %47, %50 : vector<16x16x128xf32>
    %cst_33 = arith.constant 0.000000e+00 : f32
    %52 = vector.broadcast %cst_33 : f32 to vector<16x16x128xf32>
    %53 = arith.maximumf %51, %52 : vector<16x16x128xf32>
    %c0_34 = arith.constant 0 : index
    %c0_35 = arith.constant 0 : index
    %c0_36 = arith.constant 0 : index
    %c0_37 = arith.constant 0 : index
    %54 = vector.load %arg4[%c0_34, %c0_35, %c0_36, %c0_37] : memref<1x16x16x128xf32, #tpu.memory_space<vmem>>, vector<1x16x16x128xf32>
    %55 = vector.shape_cast %54 : vector<1x16x16x128xf32> to vector<16x16x128xf32>
    %56 = vector.shape_cast %53 : vector<16x16x128xf32> to vector<1x16x16x128xf32>
    tpu.vector_store %arg4[%c0_34, %c0_35, %c0_36, %c0_37], %56 {strides = array<i32>} : memref<1x16x16x128xf32, #tpu.memory_space<vmem>>, vector<1x16x16x128xf32>,
    return
  }
  func.func @transform_0(%arg0: i32) -> (i32, i32, i32, i32) {
    %c0_i32 = arith.constant 0 : i32
    %c0_i32_0 = arith.constant 0 : i32
    %c0_i32_1 = arith.constant 0 : i32
    %c0_i32_2 = arith.constant 0 : i32
    return %arg0, %c0_i32, %c0_i32_0, %c0_i32_1 : i32, i32, i32, i32
  }
  func.func @transform_1(%arg0: i32) -> (i32, i32, i32) {
    %c0_i32 = arith.constant 0 : i32
    %c0_i32_0 = arith.constant 0 : i32
    %c0_i32_1 = arith.constant 0 : i32
    %c0_i32_2 = arith.constant 0 : i32
    return %c0_i32, %c0_i32_0, %c0_i32_1 : i32, i32, i32
  }
  func.func @transform_2(%arg0: i32) -> (i32, i32) {
    %c0_i32 = arith.constant 0 : i32
    %c0_i32_0 = arith.constant 0 : i32
    %c0_i32_1 = arith.constant 0 : i32
    return %c0_i32, %c0_i32_0 : i32, i32
  }
  func.func @transform_3(%arg0: i32) -> (i32, i32, i32, i32) {
    %c0_i32 = arith.constant 0 : i32
    %c0_i32_0 = arith.constant 0 : i32
    %c0_i32_1 = arith.constant 0 : i32
    %c0_i32_2 = arith.constant 0 : i32
    return %arg0, %c0_i32, %c0_i32_0, %c0_i32_1 : i32, i32, i32, i32
  }
}

</mosaic_0001>

<bundles_post_ra>
// kernel: conv_block_forward.1
= control target key start
LH: loop header
LB: loop body
LE: loop exit
PB: predicated region body
PF: predicated region fallthrough
CT: control target
= control target key end

     0   :  { %s2337_s12 = smov 0   ;;  %s3827_s0 = inlined_call_operand.vmem [shape: f32[2,18,18,128], index: 0, kind: input, shape index: {}]   ;;  %s3828_s1 = inlined_call_operand.vmem [shape: f32[9,128,128], index: 1, kind: input, shape index: {}]   ;;  %s3829_s2 = inlined_call_operand.vmem [shape: f32[1,128], index: 2, kind: input, shape index: {}]   ;;  %s3830_s3 = inlined_call_operand.vmem [shape: f32[2,16,16,128], index: 3, kind: output, shape index: {}]  }
   0x1 LB: > { %s2081_s13 = sadd.s32 4294967295, %s2315_s12   ;;  %p2085_p0 = scmp.ge.s32.totalorder %s2315_s12, 1  ;;  %s2315_s12 = sphi %s2337_s12, %s13_s12  }
   0x2   : > { %p137_p1 = scmp.lt.s32.totalorder %s2315_s12, 3 }
   0x4   : > { %p138_p2 = pnand %p2085_p0, %p137_p1 }
   0x6   : > { %141 = sbr.rel (%p138_p2) target bundleno = 754 (0x2f2), region = 32 }
   0xb   : > { %v2104_v0 = vld [vmem:[%s3828_s1 + $0xf8] sm:$0xff]  ;;  %v2103_v1 = vld [vmem:[%s3828_s1 + $0xf0] sm:$0xff]  ;;  %v2102_v2 = vld [vmem:[%s3828_s1 + $0xe8] sm:$0xff]  ;;  %p161_p3 = scmp.lt.s32.totalorder %s2081_s13, 1  ;;  %vm306_vm0 = vcmask 1046528   ;;  %vm662_vm1 = vcmask 1045504  }
   0xc   : > { %2220 = vmatpush.msra.mxu1 %v2104_v0  ;;  %2221 = vmatpush.msra.mxu2 %v2104_v0  ;;  %v2101_v3 = vld [vmem:[%s3828_s1 + $0xe0] sm:$0xff]  ;;  %v2100_v4 = vld [vmem:[%s3828_s1 + $0xd8] sm:$0xff]  ;;  %v2099_v5 = vld [vmem:[%s3828_s1 + $0xd0] sm:$0xff] }
   0xd   : > { %2222 = vmatpush.msra.mxu3 %v2104_v0  ;;  %419 = vmatpush.msra.mxu0 %v2104_v0  ;;  %v2098_v6 = vld [vmem:[%s3828_s1 + $0xc8] sm:$0xff]  ;;  %s4026_s13 = smov (!%p161_p3, %s2081_s13), 1  ;;  %v2097_v7 = vld [vmem:[%s3828_s1 + $0xc0] sm:$0xff]  ;;  %v2096_v8 = vld [vmem:[%s3828_s1 + $0xb8] sm:$0xff] }
   0xe   : > { %2223 = vmatpush.msra.mxu1 %v2103_v1  ;;  %2224 = vmatpush.msra.mxu2 %v2103_v1  ;;  %s2268_s5 = smul.u32 432, %s4026_s13  ;;  %v2095_v9 = vld [vmem:[%s3828_s1 + $0xb0] sm:$0xff]  ;;  %v2094_v10 = vld [vmem:[%s3828_s1 + $0xa8] sm:$0xff]  ;;  %v2093_v11 = vld [vmem:[%s3828_s1 + $0xa0] sm:$0xff]  ;;  %s2219_s19 = sshll.u32 %s4026_s13, 8 }
   0xf   : > { %2225 = vmatpush.msra.mxu3 %v2103_v1  ;;  %420 = vmatpush.msra.mxu0 %v2103_v1  ;;  %v2092_v12 = vld [vmem:[%s3828_s1 + $0x98] sm:$0xff]  ;;  %v2091_v17 = vld [vmem:[%s3828_s1 + $0x90] sm:$0xff]  ;;  %v2090_v24 = vld [vmem:[%s3828_s1 + $0x88] sm:$0xff]  ;;  %s3670_s22 = scalar_lea.vmem %s3830_s3, %s2219_s19 }
  0x10   : > { %2226 = vmatpush.msra.mxu1 %v2102_v2  ;;  %2227 = vmatpush.msra.mxu2 %v2102_v2  ;;  %s2388_s14 = scalar_lea.vmem %s3827_s0, %s2268_s5  ;;  %v2089_v27 = vld [vmem:[%s3828_s1 + $0x80] sm:$0xff]  ;;  %v2120_v32 = vld [vmem:[%s3828_s1 + $0x178] sm:$0xff]  ;;  %v2119_v40 = vld [vmem:[%s3828_s1 + $0x170] sm:$0xff] }
  0x11   : > { %2228 = vmatpush.msra.mxu3 %v2102_v2  ;;  %421 = vmatpush.msra.mxu0 %v2102_v2  ;;  %v2397_v13 = vld [vmem:[%s2388_s14 + $0x60] sm:$0xff]  ;;  %v2400_v14 = vld [vmem:[%s2388_s14 + $0x68] sm:$0xff]  ;;  %v2442_v33 = vld [vmem:[%s2388_s14 + $0x70] sm:$0x3] }
  0x12   : > { %2229 = vmatpush.msra.mxu1 %v2101_v3  ;;  %2230 = vmatpush.msra.mxu2 %v2101_v3  ;;  %v2403_v15 = vld [vmem:[%s2388_s14 + $0xc0] sm:$0xff]  ;;  %v2406_v16 = vld [vmem:[%s2388_s14 + $0xc8] sm:$0xff]  ;;  %v327_v20 = vrot.slane %v2397_v13, 1  ;;  %v328_v21 = vrot.slane %v2400_v14, 1  ;;  %v2445_v34 = vld [vmem:[%s2388_s14 + $0xd0] sm:$0x3] }
  0x13   : > { %2231 = vmatpush.msra.mxu3 %v2101_v3  ;;  %422 = vmatpush.msra.mxu0 %v2101_v3  ;;  %v207_v18 = vld [vmem:[%s2388_s14 + $0x120] sm:$0xff]  ;;  %v2413_v19 = vld [vmem:[%s2388_s14 + $0x128] sm:$0xff]  ;;  %v347_v22 = vrot.slane %v2403_v15, 1  ;;  %v348_v23 = vrot.slane %v2406_v16, 1  ;;  %v240_v36 = vld [vmem:[%s3828_s1 + $0x78] sm:$0xff]  ;;  %v330_v42 = vrot.slane %v2442_v33, 1 }
  0x14   : > { %2232 = vmatpush.msra.mxu1 %v2100_v4  ;;  %2233 = vmatpush.msra.mxu2 %v2100_v4  ;;  %v367_v25 = vrot.slane %v207_v18, 1  ;;  %v368_v26 = vrot.slane %v2413_v19, 1  ;;  %v2427_v28 = vld [vmem:[%s2388_s14] sm:$0xff]  ;;  %v2430_v29 = vld [vmem:[%s2388_s14 + $0x8] sm:$0xff]  ;;  %v2433_v30 = vsel %vm306_vm0, %v327_v20, %v328_v21  ;;  %v2136_v39 = vld [vmem:[%s3828_s1 + $0x1f8] sm:$0xff]  ;;  %v350_v43 = vrot.slane %v2445_v34, 1 }
  0x15   : > { %2234 = vmatpush.msra.mxu3 %v2100_v4  ;;  %423 = vmatpush.msra.mxu0 %v2100_v4  ;;  %v2436_v31 = vsel %vm306_vm0, %v347_v22, %v348_v23  ;;  %v307_v37 = vrot.slane %v2427_v28, 1  ;;  %v308_v38 = vrot.slane %v2430_v29, 1  ;;  %v209_v41 = vld [vmem:[%s2388_s14 + $0x130] sm:$0x3]  ;;  %v2118_v46 = vld [vmem:[%s3828_s1 + $0x168] sm:$0xff]  ;;  %v2152_v51 = vld [vmem:[%s3828_s1 + $0x278] sm:$0xff]  ;;  %v2492_v53 = vsel %vm306_vm0, %v328_v21, %v330_v42 }
  0x16   : > { %2235 = vmatpush.msra.mxu1 %v2099_v5  ;;  %2236 = vmatpush.msra.mxu2 %v2099_v5  ;;  %3896 = vst [vmem:[#allocation2_spill] sm:$0xff] %v2436_v31  ;;  %v2448_v35 = vsel %vm306_vm0, %v367_v25, %v368_v26  ;;  %v239_v44 = vld [vmem:[%s3828_s1 + $0x70] sm:$0xff]  ;;  %v370_v48 = vrot.slane %v209_v41, 1  ;;  %v238_v49 = vld [vmem:[%s3828_s1 + $0x68] sm:$0xff]  ;;  %v2495_v54 = vsel %vm306_vm0, %v348_v23, %v350_v43  ;;  %v2117_v55 = vld [vmem:[%s3828_s1 + $0x160] sm:$0xff] }
  0x17   : > { %2237 = vmatpush.msra.mxu3 %v2099_v5  ;;  %424 = vmatpush.msra.mxu0 %v2099_v5  ;;  %3897 = vst [vmem:[#allocation3_spill] sm:$0xff] %v2448_v35  ;;  %v2135_v45 = vld [vmem:[%s3828_s1 + $0x1f0] sm:$0xff]  ;;  %v309_v47 = vsel %vm306_vm0, %v307_v37, %v308_v38  ;;  %v2134_v50 = vld [vmem:[%s3828_s1 + $0x1e8] sm:$0xff]  ;;  %v2133_v56 = vld [vmem:[%s3828_s1 + $0x1e0] sm:$0xff] }
  0x18   : > { %2238 = vmatpush.msra.mxu1 %v2098_v6  ;;  %2239 = vmatpush.msra.mxu2 %v2098_v6  ;;  %v2489_v52 = vld [vmem:[%s2388_s14 + $0x10] sm:$0x3]  ;;  %3898 = vst [vmem:[#allocation4_spill] sm:$0xff] %v2495_v54  ;;  %v2504_v57 = vld [vmem:[%s2388_s14 + $0x78] sm:$0xff]  ;;  %v2507_v58 = vld [vmem:[%s2388_s14 + $0x80] sm:$0xff]  ;;  %v2516_v61 = vsel %vm306_vm0, %v368_v26, %v370_v48 }
  0x19   : > { %2240 = vmatpush.msra.mxu3 %v2098_v6  ;;  %425 = vmatpush.msra.mxu0 %v2098_v6  ;;  %v2510_v59 = vld [vmem:[%s2388_s14 + $0xd8] sm:$0xff]  ;;  %v2513_v60 = vld [vmem:[%s2388_s14 + $0xe0] sm:$0xff]  ;;  %3899 = vst [vmem:[#allocation5_spill] sm:$0xff] %v2516_v61  ;;  %v2151_v62 = vld [vmem:[%s3828_s1 + $0x270] sm:$0xff]  ;;  %v310_v63 = vrot.slane %v2489_v52, 1  ;;  %v332_v4 = vrot.slane %v2504_v57, 1 }
  0x1a   : > { %2241 = vmatpush.msra.mxu1 %v2097_v7  ;;  %2242 = vmatpush.msra.mxu2 %v2097_v7  ;;  %v210_v0 = vld [vmem:[%s2388_s14 + $0x138] sm:$0xff]  ;;  %v237_v1 = vld [vmem:[%s3828_s1 + $0x60] sm:$0xff]  ;;  %v333_v5 = vrot.slane %v2507_v58, 1  ;;  %v352_v6 = vrot.slane %v2510_v59, 1  ;;  %v2131_v18 = vld [vmem:[%s3828_s1 + $0x1d0] sm:$0xff] }
  0x1b   : > { %2243 = vmatpush.msra.mxu3 %v2097_v7  ;;  %426 = vmatpush.msra.mxu0 %v2097_v7  ;;  %v2116_v2 = vld [vmem:[%s3828_s1 + $0x158] sm:$0xff]  ;;  %v2532_v3 = vld [vmem:[%s2388_s14 + $0x140] sm:$0xff]  ;;  %v353_v7 = vrot.slane %v2513_v60, 1  ;;  %v372_v16 = vrot.slane %v210_v0, 1  ;;  %v235_v20 = vld [vmem:[%s3828_s1 + $0x50] sm:$0xff] }
  0x1c   : > { %2244 = vmatpush.msra.mxu1 %v2096_v8  ;;  %2245 = vmatpush.msra.mxu2 %v2096_v8  ;;  %v2149_v19 = vld [vmem:[%s3828_s1 + $0x260] sm:$0xff]  ;;  %v2565_v21 = vld [vmem:[%s2388_s14 + $0x18] sm:$0xff]  ;;  %v2573_v23 = vsel %vm306_vm0, %v332_v4, %v333_v5  ;;  %v2579_v25 = vld [vmem:[%s2388_s14 + $0x88] sm:$0x3] }
  0x1d   : > { %2246 = vmatpush.msra.mxu3 %v2096_v8  ;;  %427 = vmatpush.msra.mxu0 %v2096_v8  ;;  %v2132_v8 = vld [vmem:[%s3828_s1 + $0x1d8] sm:$0xff]  ;;  %v2568_v22 = vld [vmem:[%s2388_s14 + $0x20] sm:$0xff]  ;;  %3900 = vst [vmem:[#allocation6_spill] sm:$0xff] %v2573_v23  ;;  %v2582_v26 = vld [vmem:[%s2388_s14 + $0xe8] sm:$0x3]  ;;  %v312_v37 = vrot.slane %v2565_v21, 1 }
  0x1e   : > { %2247 = vmatpush.msra.mxu1 %v2095_v9  ;;  %2248 = vmatpush.msra.mxu2 %v2095_v9  ;;  %v234_v41 = vld [vmem:[%s3828_s1 + $0x48] sm:$0xff]  ;;  %v2113_v42 = vld [vmem:[%s3828_s1 + $0x140] sm:$0xff]  ;;  %v335_v43 = vrot.slane %v2579_v25, 1  ;;  %v2112_v48 = vld [vmem:[%s3828_s1 + $0x138] sm:$0xff] }
  0x1f   : > { %2249 = vmatpush.msra.mxu3 %v2095_v9  ;;  %428 = vmatpush.msra.mxu0 %v2095_v9  ;;  %v2150_v9 = vld [vmem:[%s3828_s1 + $0x268] sm:$0xff]  ;;  %v2658_v4 = vld [vmem:[%s2388_s14 + $0xf8] sm:$0xff] }
  0x20   : > { %2250 = vmatpush.msra.mxu1 %v2094_v10  ;;  %2251 = vmatpush.msra.mxu2 %v2094_v10 }
  0x21   : > { %2252 = vmatpush.msra.mxu3 %v2094_v10  ;;  %429 = vmatpush.msra.mxu0 %v2094_v10  ;;  %v236_v10 = vld [vmem:[%s3828_s1 + $0x58] sm:$0xff] }
  0x22   : > { %2253 = vmatpush.msra.mxu1 %v2093_v11  ;;  %2254 = vmatpush.msra.mxu2 %v2093_v11 }
  0x23   : > { %2255 = vmatpush.msra.mxu3 %v2093_v11  ;;  %430 = vmatpush.msra.mxu0 %v2093_v11  ;;  %v2115_v11 = vld [vmem:[%s3828_s1 + $0x150] sm:$0xff] }
  0x24   : > { %2256 = vmatpush.msra.mxu1 %v2092_v12  ;;  %2257 = vmatpush.msra.mxu2 %v2092_v12 }
  0x25   : > { %2258 = vmatpush.msra.mxu3 %v2092_v12  ;;  %431 = vmatpush.msra.mxu0 %v2092_v12  ;;  %v311_v12 = vsel %vm306_vm0, %v308_v38, %v310_v63  ;;  %v313_v38 = vrot.slane %v2568_v22, 1  ;;  %v2642_v63 = vsel %vm306_vm0, %v333_v5, %v335_v43  ;;  %v2111_v5 = vld [vmem:[%s3828_s1 + $0x130] sm:$0xff] }
  0x26   : > { %2259 = vmatpush.msra.mxu1 %v2091_v17  ;;  %2260 = vmatpush.msra.mxu2 %v2091_v17  ;;  %3902 = vst [vmem:[#allocation8_spill] sm:$0xff] %v2642_v63  ;;  %v2709_v43 = vld [vmem:[%s2388_s14 + $0x30] sm:$0xff] }
  0x27   : > { %2261 = vmatpush.msra.mxu3 %v2091_v17  ;;  %432 = vmatpush.msra.mxu0 %v2091_v17  ;;  %v373_v17 = vrot.slane %v2532_v3, 1  ;;  %v2654_v3 = vld [vmem:[%s2388_s14 + $0xf0] sm:$0xff] }
  0x28   : > { %2262 = vmatpush.msra.mxu1 %v2090_v24  ;;  %2263 = vmatpush.msra.mxu2 %v2090_v24 }
  0x29   : > { %2264 = vmatpush.msra.mxu3 %v2090_v24  ;;  %433 = vmatpush.msra.mxu0 %v2090_v24  ;;  %v2576_v24 = vsel %vm306_vm0, %v352_v6, %v353_v7  ;;  %v2127_v6 = vld [vmem:[%s3828_s1 + $0x1b0] sm:$0xff] }
  0x2a   : > { %2265 = vmatpush.msra.mxu1 %v2089_v27  ;;  %2266 = vmatpush.msra.mxu2 %v2089_v27 }
  0x2b   : > { %459 = vmatmul.f32.vlgmr.msra.gmra.mxu1 %v2433_v30  ;;  %483 = vmatmul.f32.vlgmr.msra.gmra.mxu2 %v2436_v31 }
  0x2c   : > { %775 = vmatpush.msrb.mxu2 %v2120_v32  ;;  %2267 = vmatpush.msra.mxu3 %v2089_v27  ;;  %v2130_v32 = vld [vmem:[%s3828_s1 + $0x1c8] sm:$0xff] }
  0x2d   : > { %507 = vmatmul.f32.vlgmr.msra.gmra.mxu3 %v2448_v35  ;;  %532 = vmatpush.msrb.mxu1 %v240_v36  ;;  %v2591_v36 = vsel %vm306_vm0, %v372_v16, %v373_v17  ;;  %v2110_v16 = vld [vmem:[%s3828_s1 + $0x128] sm:$0xff] }
  0x2e   : > { %937 = vmatpush.msrb.mxu3 %v2136_v39  ;;  %776 = vmatpush.msrb.mxu2 %v2119_v40  ;;  %3901 = vst [vmem:[#allocation7_spill] sm:$0xff] %v2591_v36  ;;  %v2148_v39 = vld [vmem:[%s3828_s1 + $0x258] sm:$0xff]  ;;  %v212_v40 = vld [vmem:[%s2388_s14 + $0x148] sm:$0x3] }
  0x2f   : > { %533 = vmatpush.msrb.mxu1 %v239_v44  ;;  %434 = vmatpush.msra.mxu0 %v2089_v27  ;;  %v2114_v27 = vld [vmem:[%s3828_s1 + $0x148] sm:$0xff]  ;;  %v355_v44 = vrot.slane %v2582_v26, 1 }
  0x30   : > { %938 = vmatpush.msrb.mxu3 %v2135_v45  ;;  %777 = vmatpush.msrb.mxu2 %v2118_v46  ;;  %v2129_v45 = vld [vmem:[%s3828_s1 + $0x1c0] sm:$0xff]  ;;  %v2147_v46 = vld [vmem:[%s3828_s1 + $0x250] sm:$0xff]  ;;  %v2871_v35 = vld [vmem:[%s2388_s14 + $0x48] sm:$0xff] }
  0x31   : > { %435 = vmatmul.f32.vlgmr.msra.gmra.mxu0 %v309_v47  ;;  %534 = vmatpush.msrb.mxu1 %v238_v49  ;;  %v233_v47 = vld [vmem:[%s3828_s1 + $0x40] sm:$0xff]  ;;  %v2625_v49 = vsel %vm306_vm0, %v312_v37, %v313_v38  ;;  %v2645_v0 = vsel %vm306_vm0, %v353_v7, %v355_v44  ;;  %v230_v37 = vld [vmem:[%s3828_s1 + $0x28] sm:$0xff] }
  0x32   : > { %939 = vmatpush.msrb.mxu3 %v2134_v50  ;;  %1109 = vmatpush.msrb.mxu0 %v2152_v51  ;;  %v375_v50 = vrot.slane %v212_v40, 1  ;;  %v2128_v51 = vld [vmem:[%s3828_s1 + $0x1b8] sm:$0xff]  ;;  %v2125_v44 = vld [vmem:[%s3828_s1 + $0x1a0] sm:$0xff] }
  0x33   : > { %462 = vmatmul.f32.gmra.mxu1 %v2492_v53  ;;  %486 = vmatmul.f32.gmra.mxu2 %v2495_v54 }
  0x34   : > { %778 = vmatpush.msrb.mxu2 %v2117_v55  ;;  %940 = vmatpush.msrb.mxu3 %v2133_v56  ;;  %v2631_v55 = vld [vmem:[%s2388_s14 + $0x28] sm:$0x3]  ;;  %v2667_v7 = vsel %vm306_vm0, %v373_v17, %v375_v50  ;;  %v2734_v50 = vld [vmem:[%s2388_s14 + $0xa0] sm:$0x3] }
  0x35   : > { %510 = vmatmul.f32.gmra.mxu3 %v2516_v61  ;;  %1110 = vmatpush.msrb.mxu0 %v2151_v62  ;;  %v2146_v56 = vld [vmem:[%s3828_s1 + $0x248] sm:$0xff]  ;;  %v232_v62 = vld [vmem:[%s3828_s1 + $0x38] sm:$0xff]  ;;  %3903 = vst [vmem:[#allocation9_spill] sm:$0xff] %v2667_v7 }
  0x36   : > { %535 = vmatpush.msrb.mxu1 %v237_v1  ;;  %779 = vmatpush.msrb.mxu2 %v2116_v2  ;;  %v2648_v1 = vld [vmem:[%s2388_s14 + $0x90] sm:$0xff]  ;;  %v2651_v2 = vld [vmem:[%s2388_s14 + $0x98] sm:$0xff] }
  0x37   : > { %941 = vmatpush.msrb.mxu3 %v2132_v8  ;;  %1111 = vmatpush.msrb.mxu0 %v2150_v9  ;;  %v315_v8 = vrot.slane %v2631_v55, 1  ;;  %v213_v9 = vld [vmem:[%s2388_s14 + $0x150] sm:$0xff]  ;;  %v337_v17 = vrot.slane %v2648_v1, 1 }
  0x38   : > { %536 = vmatpush.msrb.mxu1 %v236_v10  ;;  %780 = vmatpush.msrb.mxu2 %v2115_v11  ;;  %v2145_v10 = vld [vmem:[%s3828_s1 + $0x240] sm:$0xff]  ;;  %v2677_v11 = vld [vmem:[%s2388_s14 + $0x158] sm:$0xff] }
  0x39   : > { %438 = vmatmul.f32.gmra.mxu0 %v311_v12  ;;  %942 = vmatpush.msrb.mxu3 %v2131_v18  ;;  %v231_v12 = vld [vmem:[%s3828_s1 + $0x30] sm:$0xff]  ;;  %v338_v18 = vrot.slane %v2651_v2, 1  ;;  %v2705_v40 = vsel %vm306_vm0, %v313_v38, %v315_v8 }
  0x3a   : > { %1112 = vmatpush.msrb.mxu0 %v2149_v19  ;;  %537 = vmatpush.msrb.mxu1 %v235_v20  ;;  %v357_v19 = vrot.slane %v2654_v3, 1  ;;  %v358_v20 = vrot.slane %v2658_v4, 1  ;;  %v2143_v38 = vld [vmem:[%s3828_s1 + $0x230] sm:$0xff] }
  0x3b   : > { %465 = vmatmul.f32.gmra.mxu1 %v2573_v23  ;;  %489 = vmatmul.f32.gmra.mxu2 %v2576_v24 }
  0x3c   : > { %781 = vmatpush.msrb.mxu2 %v2114_v27  ;;  %943 = vmatpush.msrb.mxu3 %v2130_v32  ;;  %v2126_v27 = vld [vmem:[%s3828_s1 + $0x1a8] sm:$0xff]  ;;  %v2144_v32 = vld [vmem:[%s3828_s1 + $0x238] sm:$0xff] }
  0x3d   : > { %513 = vmatmul.f32.gmra.mxu3 %v2591_v36  ;;  %1113 = vmatpush.msrb.mxu0 %v2148_v39  ;;  %v2109_v39 = vld [vmem:[%s3828_s1 + $0x120] sm:$0xff] }
  0x3e   : > { %538 = vmatpush.msrb.mxu1 %v234_v41  ;;  %782 = vmatpush.msrb.mxu2 %v2113_v42  ;;  %v377_v41 = vrot.slane %v213_v9, 1  ;;  %v378_v42 = vrot.slane %v2677_v11, 1  ;;  %v2142_v9 = vld [vmem:[%s3828_s1 + $0x228] sm:$0xff]  ;;  %v225_v11 = vld [vmem:[%s3828_s1] sm:$0xff] }
  0x3f   : > { %944 = vmatpush.msrb.mxu3 %v2129_v45  ;;  %1114 = vmatpush.msrb.mxu0 %v2147_v46  ;;  %v2715_v45 = vld [vmem:[%s2388_s14 + $0x38] sm:$0xff]  ;;  %v229_v46 = vld [vmem:[%s3828_s1 + $0x20] sm:$0xff] }
  0x40   : > { %539 = vmatpush.msrb.mxu1 %v233_v47  ;;  %783 = vmatpush.msrb.mxu2 %v2112_v48  ;;  %v2726_v47 = vsel %vm306_vm0, %v337_v17, %v338_v18  ;;  %v2731_v48 = vsel %vm306_vm0, %v357_v19, %v358_v20  ;;  %v3831_v8 = vrot.slane %v2715_v45, 1  ;;  %v340_v17 = vrot.slane %v2734_v50, 1 }
  0x41   : > { %441 = vmatmul.f32.gmra.mxu0 %v2625_v49  ;;  %945 = vmatpush.msrb.mxu3 %v2128_v51  ;;  %3904 = vst [vmem:[#allocation10_spill] sm:$0xff] %v2726_v47  ;;  %v2738_v51 = vld [vmem:[%s2388_s14 + $0x100] sm:$0x3]  ;;  %v3912_v36 = vrot.slane %v2715_v45, 1 }
  0x42   : > { %1115 = vmatpush.msrb.mxu0 %v2146_v56  ;;  %540 = vmatpush.msrb.mxu1 %v232_v62  ;;  %v2108_v56 = vld [vmem:[%s3828_s1 + $0x118] sm:$0xff]  ;;  %v360_v19 = vrot.slane %v2738_v51, 1 }
  0x43   : > { %468 = vmatmul.f32.gmra.mxu1 %v2642_v63  ;;  %492 = vmatmul.f32.gmra.mxu2 %v2645_v0  ;;  %v2124_v62 = vld [vmem:[%s3828_s1 + $0x198] sm:$0xff] }
  0x44   : > { %784 = vmatpush.msrb.mxu2 %v2111_v5  ;;  %946 = vmatpush.msrb.mxu3 %v2127_v6  ;;  %v2749_v5 = vsel %vm306_vm0, %v377_v41, %v378_v42  ;;  %v317_v6 = vrot.slane %v2709_v43, 1 }
  0x45   : > { %516 = vmatmul.f32.gmra.mxu3 %v2667_v7  ;;  %1116 = vmatpush.msrb.mxu0 %v2145_v10  ;;  %3905 = vst [vmem:[#allocation11_spill] sm:$0xff] %v2749_v5  ;;  %v215_v10 = vld [vmem:[%s2388_s14 + $0x160] sm:$0x3]  ;;  %v2168_v7 = vld [vmem:[%s3828_s1 + $0x2f8] sm:$0xff] }
  0x46   : > { %541 = vmatpush.msrb.mxu1 %v231_v12  ;;  %785 = vmatpush.msrb.mxu2 %v2110_v16  ;;  %v228_v12 = vld [vmem:[%s3828_s1 + $0x18] sm:$0xff]  ;;  %v2107_v16 = vld [vmem:[%s3828_s1 + $0x110] sm:$0xff]  ;;  %v2783_v41 = vsel %vm306_vm0, %v317_v6, %v3831_v8  ;;  %v2800_v6 = vsel %vm306_vm0, %v338_v18, %v340_v17  ;;  %v2105_v18 = vld [vmem:[%s3828_s1 + $0x100] sm:$0xff] }
  0x47   : > { %947 = vmatpush.msrb.mxu3 %v2126_v27  ;;  %1117 = vmatpush.msrb.mxu0 %v2144_v32  ;;  %v2123_v27 = vld [vmem:[%s3828_s1 + $0x190] sm:$0xff]  ;;  %v2141_v32 = vld [vmem:[%s3828_s1 + $0x220] sm:$0xff]  ;;  %3906 = vst [vmem:[#allocation12_spill] sm:$0xff] %v2800_v6  ;;  %v2138_v8 = vld [vmem:[%s3828_s1 + $0x208] sm:$0xff] }
  0x48   : > { %542 = vmatpush.msrb.mxu1 %v230_v37  ;;  %786 = vmatpush.msrb.mxu2 %v2109_v39  ;;  %v227_v37 = vld [vmem:[%s3828_s1 + $0x10] sm:$0xff]  ;;  %v2106_v39 = vld [vmem:[%s3828_s1 + $0x108] sm:$0xff] }
  0x49   : > { %444 = vmatmul.f32.gmra.mxu0 %v2705_v40  ;;  %948 = vmatpush.msrb.mxu3 %v2125_v44  ;;  %v380_v44 = vrot.slane %v215_v10, 1  ;;  %v2808_v10 = vld [vmem:[%s2388_s14 + $0xa8] sm:$0xff] }
  0x4a   : > { %1118 = vmatpush.msrb.mxu0 %v2143_v38  ;;  %543 = vmatpush.msrb.mxu1 %v229_v46  ;;  %v2122_v38 = vld [vmem:[%s3828_s1 + $0x188] sm:$0xff]  ;;  %v2789_v46 = vld [vmem:[%s2388_s14 + $0x40] sm:$0x3] }
  0x4b   : > { %471 = vmatmul.f32.gmra.mxu1 %v2726_v47  ;;  %495 = vmatmul.f32.gmra.mxu2 %v2731_v48  ;;  %v2829_v17 = vsel %vm306_vm0, %v378_v42, %v380_v44  ;;  %v2184_v42 = vld [vmem:[%s3828_s1 + $0x378] sm:$0xff]  ;;  %v342_v44 = vrot.slane %v2808_v10, 1 }
  0x4c   : > { %787 = vmatpush.msrb.mxu2 %v2108_v56  ;;  %949 = vmatpush.msrb.mxu3 %v2124_v62  ;;  %v2140_v56 = vld [vmem:[%s3828_s1 + $0x218] sm:$0xff]  ;;  %v226_v62 = vld [vmem:[%s3828_s1 + $0x8] sm:$0xff]  ;;  %3909 = vst [vmem:[#allocation15_spill] sm:$0xff] %v2829_v17 }
  0x4d   : > { %519 = vmatmul.f32.gmra.mxu3 %v2749_v5  ;;  %1119 = vmatpush.msrb.mxu0 %v2142_v9  ;;  %v2805_v9 = vsel %vm306_vm0, %v358_v20, %v360_v19  ;;  %v2121_v20 = vld [vmem:[%s3828_s1 + $0x180] sm:$0xff]  ;;  %v320_v19 = vrot.slane %v2789_v46, 1  ;;  %v2200_v5 = vld [vmem:[%s3828_s1 + $0x3f8] sm:$0xff] }
  0x4e   : > { %544 = vmatpush.msrb.mxu1 %v228_v12  ;;  %788 = vmatpush.msrb.mxu2 %v2107_v16  ;;  %v2811_v12 = vld [vmem:[%s2388_s14 + $0xb0] sm:$0xff]  ;;  %v2814_v16 = vld [vmem:[%s2388_s14 + $0x108] sm:$0xff] }
  0x4f   : > { %950 = vmatpush.msrb.mxu3 %v2123_v27  ;;  %1120 = vmatpush.msrb.mxu0 %v2141_v32  ;;  %3907 = vst [vmem:[#allocation13_spill] sm:$0xff] %v2814_v16  ;;  %v2818_v27 = vld [vmem:[%s2388_s14 + $0x110] sm:$0xff]  ;;  %v2833_v32 = vld [vmem:[%s2388_s14 + $0x168] sm:$0xff] }
  0x50   : > { %545 = vmatpush.msrb.mxu1 %v227_v37  ;;  %789 = vmatpush.msrb.mxu2 %v2106_v39  ;;  %3908 = vst [vmem:[#allocation14_spill] sm:$0xff] %v2818_v27  ;;  %v2139_v37 = vld [vmem:[%s3828_s1 + $0x210] sm:$0xff] }
  0x51   : > { %447 = vmatmul.f32.gmra.mxu0 %v2783_v41  ;;  %951 = vmatpush.msrb.mxu3 %v2122_v38  ;;  %3910 = vst [vmem:[#allocation16_spill] sm:$0xff] %v2833_v32  ;;  %v2841_v39 = vld [vmem:[%s2388_s14 + $0x170] sm:$0xff]  ;;  %v343_v38 = vrot.slane %v2811_v12, 1 }
  0x52   : > { %1121 = vmatpush.msrb.mxu0 %v2140_v56  ;;  %546 = vmatpush.msrb.mxu1 %v226_v62  ;;  %3911 = vst [vmem:[#allocation17_spill] sm:$0xff] %v2841_v39  ;;  %v362_v56 = vrot.slane %v2814_v16, 1  ;;  %v363_v62 = vrot.slane %v2818_v27, 1  ;;  %v383_v61 = vrot.slane %v2841_v39, 1  ;;  %v2167_v27 = vld [vmem:[%s3828_s1 + $0x2f0] sm:$0xff] }
  0x53   : > { %474 = vmatmul.f32.gmra.mxu1 %v2800_v6  ;;  %498 = vmatmul.f32.gmra.mxu2 %v2805_v9 }
  0x54   : > { %790 = vmatpush.msrb.mxu2 %v2105_v18  ;;  %952 = vmatpush.msrb.mxu3 %v2121_v20  ;;  %v2866_v18 = vsel %vm306_vm0, %v3912_v36, %v320_v19  ;;  %v382_v20 = vrot.slane %v2833_v32, 1  ;;  %v2880_v36 = vsel %vm306_vm0, %v342_v44, %v343_v38  ;;  %v2883_v19 = vsel %vm306_vm0, %v362_v56, %v363_v62  ;;  %v2183_v56 = vld [vmem:[%s3828_s1 + $0x370] sm:$0xff] }
  0x55   : > { %522 = vmatmul.f32.gmra.mxu3 %v2829_v17  ;;  %1122 = vmatpush.msrb.mxu0 %v2139_v37  ;;  %v2874_v37 = vld [vmem:[%s2388_s14 + $0x50] sm:$0xff]  ;;  %v2137_v17 = vld [vmem:[%s3828_s1 + $0x200] sm:$0xff]  ;;  %3913 = vst [vmem:[#allocation18_spill] sm:$0xff] %v2880_v36  ;;  %v322_v44 = vrot.slane %v2871_v35, 1 }
  0x56   : > { %547 = vmatpush.msrb.mxu1 %v225_v11  ;;  %1440 = vmatpush.msra.mxu2 %v2184_v42  ;;  %3914 = vst [vmem:[#allocation19_spill] sm:$0xff] %v2883_v19  ;;  %v2887_v11 = vld [vmem:[%s2388_s14 + $0xb8] sm:$0x3]  ;;  %v323_v39 = vrot.slane %v2874_v37, 1 }
  0x57   : > { %1123 = vmatpush.msrb.mxu0 %v2138_v8  ;;  %1612 = vmatpush.msra.mxu3 %v2200_v5  ;;  %v2890_v42 = vld [vmem:[%s2388_s14 + $0x118] sm:$0x3]  ;;  %v2896_v8 = vsel %vm306_vm0, %v382_v20, %v383_v61  ;;  %v345_v32 = vrot.slane %v2887_v11, 1 }
  0x58   : > { %1278 = vmatpush.msra.mxu1 %v2168_v7  ;;  %3915 = vst [vmem:[#allocation20_spill] sm:$0xff] %v2890_v42  ;;  %v2216_v5 = vld [vmem:[%s3828_s1 + $0x478] sm:$0xff]  ;;  %v365_v20 = vrot.slane %v2890_v42, 1  ;;  %1441 = vmatpush.msra.mxu2 %v2183_v56 }
  0x59   : > { %450 = vmatmul.f32.gmra.mxu0 %v2866_v18  ;;  %3916 = vst [vmem:[#allocation21_spill] sm:$0xff] %v2896_v8  ;;  %v2903_v7 = vld [vmem:[%s2388_s14 + $0x178] sm:$0x3] }
  0x5a   : > { %1124 = vmatpush.msrb.mxu0 %v2137_v17  ;;  %v2199_v17 = vld [vmem:[%s3828_s1 + $0x3f0] sm:$0xff]  ;;  %v385_v16 = vrot.slane %v2903_v7, 1  ;;  %1279 = vmatpush.msra.mxu1 %v2167_v27  ;;  %v2922_v42 = vld [vmem:[%s2388_s14 + $0x58] sm:$0x3]  ;;  %v2928_v56 = vsel %vm306_vm0, %v363_v62, %v365_v20  ;;  %v663_v27 = vrot.slane %v2427_v28, 2  ;;  %v666_v62 = vrot.slane %v2489_v52, 2 }
  0x5b   : > { %477 = vmatmul.f32.gmra.mxu1 %v2880_v36  ;;  %501 = vmatmul.f32.gmra.mxu2 %v2883_v19  ;;  %v2918_v19 = vsel %vm306_vm0, %v322_v44, %v323_v39  ;;  %3918 = vst [vmem:[#allocation23_spill] sm:$0xff] %v2928_v56  ;;  %v325_v44 = vrot.slane %v2922_v42, 1  ;;  %v2166_v20 = vld [vmem:[%s3828_s1 + $0x2e8] sm:$0xff]  ;;  %v668_v52 = vrot.slane %v2565_v21, 2 }
  0x5c   : > { %1781 = vmatpush.msra.mxu0 %v2216_v5  ;;  %1613 = vmatpush.msra.mxu3 %v2199_v17  ;;  %v2925_v5 = vsel %vm306_vm0, %v343_v38, %v345_v32  ;;  %v664_v17 = vrot.slane %v2430_v29, 2  ;;  %v2215_v32 = vld [vmem:[%s3828_s1 + $0x470] sm:$0xff]  ;;  %v2182_v38 = vld [vmem:[%s3828_s1 + $0x368] sm:$0xff] }
  0x5d   : > { %525 = vmatmul.f32.gmra.mxu3 %v2896_v8  ;;  %3917 = vst [vmem:[#allocation22_spill] sm:$0xff] %v2925_v5  ;;  %v2932_v8 = vsel %vm306_vm0, %v383_v61, %v385_v16  ;;  %v2944_v61 = vsel %vm306_vm0, %v323_v39, %v325_v44  ;;  %1442 = vmatpush.msra.mxu2 %v2182_v38  ;;  %v2198_v39 = vld [vmem:[%s3828_s1 + $0x3e8] sm:$0xff]  ;;  %v669_v44 = vrot.slane %v2568_v22, 2  ;;  %v2213_v38 = vld [vmem:[%s3828_s1 + $0x460] sm:$0xff] }
  0x5e   : > { %3919 = vst [vmem:[#allocation24_spill] sm:$0xff] %v2932_v8  ;;  %1782 = vmatpush.msra.mxu0 %v2215_v32  ;;  %v665_v16 = vsel %vm662_vm1, %v663_v27, %v664_v17  ;;  %1614 = vmatpush.msra.mxu3 %v2198_v39  ;;  %v2214_v27 = vld [vmem:[%s3828_s1 + $0x468] sm:$0xff]  ;;  %v676_v39 = vrot.slane %v2789_v46, 2  ;;  %v678_v46 = vrot.slane %v2871_v35, 2 }
  0x5f   : > { %1280 = vmatpush.msra.mxu1 %v2166_v20  ;;  %v2970_v32 = vsel %vm662_vm1, %v668_v52, %v669_v44  ;;  %v2196_v20 = vld [vmem:[%s3828_s1 + $0x3d8] sm:$0xff]  ;;  %v679_v52 = vrot.slane %v2874_v37, 2 }
  0x60   : > { %1783 = vmatpush.msra.mxu0 %v2214_v27 }
  0x61   : > { %453 = vmatmul.f32.gmra.mxu0 %v2918_v19  ;;  %v3028_v27 = vsel %vm662_vm1, %v678_v46, %v679_v52 }
  0x62   : > { %1784 = vmatpush.msra.mxu0 %v2213_v38 }
  0x63   : > { %480 = vmatmul.f32.gmra.mxu1 %v2925_v5  ;;  %504 = vmatmul.f32.gmra.mxu2 %v2928_v56 }
  0x65   : > { %528 = vmatmul.f32.gmra.mxu3 %v2932_v8 }
  0x69   : > { %456 = vmatmul.f32.gmra.mxu0 %v2944_v61 }
  0x6b   : > { %548 = vmatmul.f32.vlgmr.msrb.gmra.mxu1 %v2427_v28  ;;  %791 = vmatmul.f32.vlgmr.msrb.gmra.mxu2 %v665_v16  ;;  %v667_v28 = vsel %vm662_vm1, %v664_v17, %v666_v62  ;;  %v2197_v17 = vld [vmem:[%s3828_s1 + $0x3e0] sm:$0xff]  ;;  %v674_v16 = vrot.slane %v2715_v45, 2 }
  0x6c   : > { %1615 = vmatpush.msra.mxu3 %v2197_v17 }
  0x6d   : > { %953 = vmatmul.f32.vlgmr.msrb.gmra.mxu3 %v2565_v21 }
  0x6e   : > { %1616 = vmatpush.msra.mxu3 %v2196_v20 }
  0x71   : > { %1125 = vmatmul.f32.vlgmr.msrb.gmra.mxu0 %v2625_v49  ;;  %v671_v49 = vrot.slane %v2631_v55, 2  ;;  %v673_v55 = vrot.slane %v2709_v43, 2 }
  0x73   : > { %551 = vmatmul.f32.gmra.mxu1 %v2430_v29  ;;  %794 = vmatmul.f32.gmra.mxu2 %v667_v28  ;;  %v2181_v29 = vld [vmem:[%s3828_s1 + $0x360] sm:$0xff]  ;;  %v2999_v62 = vsel %vm662_vm1, %v673_v55, %v674_v16  ;;  %v3016_v28 = vsel %vm662_vm1, %v674_v16, %v676_v39  ;;  %v2211_v55 = vld [vmem:[%s3828_s1 + $0x450] sm:$0xff]  ;;  %v2194_v39 = vld [vmem:[%s3828_s1 + $0x3c8] sm:$0xff] }
  0x74   : > { %1443 = vmatpush.msra.mxu2 %v2181_v29  ;;  %v681_v29 = vrot.slane %v2922_v42, 2  ;;  %v683_v42 = vrot.slane %v2397_v13, 2 }
  0x75   : > { %956 = vmatmul.f32.gmra.mxu3 %v2568_v22 }
  0x76   : > { %v3045_v17 = vsel %vm662_vm1, %v679_v52, %v681_v29  ;;  %v2210_v29 = vld [vmem:[%s3828_s1 + $0x448] sm:$0xff] }
  0x79   : > { %1128 = vmatmul.f32.gmra.mxu0 %v2705_v40  ;;  %v2165_v40 = vld [vmem:[%s3828_s1 + $0x2e0] sm:$0xff] }
  0x7a   : > { %1281 = vmatpush.msra.mxu1 %v2165_v40  ;;  %v684_v40 = vrot.slane %v2400_v14, 2 }
  0x7b   : > { %554 = vmatmul.f32.gmra.mxu1 %v2565_v21  ;;  %797 = vmatmul.f32.gmra.mxu2 %v2970_v32  ;;  %v2987_v21 = vsel %vm662_vm1, %v669_v44, %v671_v49  ;;  %v2212_v44 = vld [vmem:[%s3828_s1 + $0x458] sm:$0xff]  ;;  %v2195_v49 = vld [vmem:[%s3828_s1 + $0x3d0] sm:$0xff] }
  0x7c   : > { %1785 = vmatpush.msra.mxu0 %v2212_v44  ;;  %1617 = vmatpush.msra.mxu3 %v2195_v49  ;;  %v3059_v38 = vsel %vm662_vm1, %v683_v42, %v684_v40  ;;  %v688_v44 = vrot.slane %v2504_v57, 2 }
  0x7d   : > { %959 = vmatmul.f32.gmra.mxu3 %v2709_v43 }
  0x7e   : > { %1786 = vmatpush.msra.mxu0 %v2211_v55  ;;  %1618 = vmatpush.msra.mxu3 %v2194_v39  ;;  %v2177_v55 = vld [vmem:[%s3828_s1 + $0x340] sm:$0xff] }
  0x80   : > { %1787 = vmatpush.msra.mxu0 %v2210_v29 }
  0x81   : > { %1131 = vmatmul.f32.gmra.mxu0 %v2783_v41 }
  0x83   : > { %557 = vmatmul.f32.gmra.mxu1 %v2568_v22  ;;  %800 = vmatmul.f32.gmra.mxu2 %v2987_v21  ;;  %v2180_v22 = vld [vmem:[%s3828_s1 + $0x358] sm:$0xff] }
  0x84   : > { %1444 = vmatpush.msra.mxu2 %v2180_v22  ;;  %v686_v22 = vrot.slane %v2442_v33, 2 }
  0x85   : > { %962 = vmatmul.f32.gmra.mxu3 %v2715_v45 }
  0x86   : > { %v3084_v52 = vsel %vm662_vm1, %v684_v40, %v686_v22  ;;  %v2193_v22 = vld [vmem:[%s3828_s1 + $0x3c0] sm:$0xff] }
  0x87   : > { %1619 = vmatpush.msra.mxu3 %v2193_v22  ;;  %v694_v22 = vrot.slane %v2651_v2, 2 }
  0x89   : > { %1134 = vmatmul.f32.gmra.mxu0 %v2866_v18 }
  0x8b   : > { %560 = vmatmul.f32.gmra.mxu1 %v2709_v43  ;;  %803 = vmatmul.f32.gmra.mxu2 %v2999_v62  ;;  %v2164_v43 = vld [vmem:[%s3828_s1 + $0x2d8] sm:$0xff] }
  0x8c   : > { %1282 = vmatpush.msra.mxu1 %v2164_v43 }
  0x8d   : > { %965 = vmatmul.f32.gmra.mxu3 %v2871_v35 }
  0x91   : > { %1137 = vmatmul.f32.gmra.mxu0 %v2918_v19 }
  0x93   : > { %563 = vmatmul.f32.gmra.mxu1 %v2715_v45  ;;  %806 = vmatmul.f32.gmra.mxu2 %v3016_v28  ;;  %v2179_v45 = vld [vmem:[%s3828_s1 + $0x350] sm:$0xff] }
  0x94   : > { %1445 = vmatpush.msra.mxu2 %v2179_v45  ;;  %v689_v45 = vrot.slane %v2507_v58, 2 }
  0x95   : > { %968 = vmatmul.f32.gmra.mxu3 %v2874_v37 }
  0x96   : > { %v3104_v40 = vsel %vm662_vm1, %v688_v44, %v689_v45 }
  0x97   : > { %3922 = vst [vmem:[#allocation27_spill] sm:$0xff] %v3104_v40 }
  0x99   : > { %1140 = vmatmul.f32.gmra.mxu0 %v2944_v61 }
  0x9b   : > { %566 = vmatmul.f32.gmra.mxu1 %v2871_v35  ;;  %809 = vmatmul.f32.gmra.mxu2 %v3028_v27  ;;  %v2163_v35 = vld [vmem:[%s3828_s1 + $0x2d0] sm:$0xff] }
  0x9c   : > { %1283 = vmatpush.msra.mxu1 %v2163_v35 }
  0x9d   : > { %971 = vmatmul.f32.gmra.mxu3 %v2397_v13 }
  0xa1   : > { %1143 = vmatmul.f32.gmra.mxu0 %v2433_v30 }
  0xa3   : > { %569 = vmatmul.f32.gmra.mxu1 %v2874_v37  ;;  %812 = vmatmul.f32.gmra.mxu2 %v3045_v17  ;;  %v2178_v37 = vld [vmem:[%s3828_s1 + $0x348] sm:$0xff] }
  0xa4   : > { %1446 = vmatpush.msra.mxu2 %v2178_v37  ;;  %v691_v37 = vrot.slane %v2579_v25, 2 }
  0xa5   : > { %974 = vmatmul.f32.gmra.mxu3 %v2400_v14 }
  0xa6   : > { %1447 = vmatpush.msra.mxu2 %v2177_v55  ;;  %v3129_v29 = vsel %vm662_vm1, %v689_v45, %v691_v37  ;;  %v693_v55 = vrot.slane %v2648_v1, 2 }
  0xa7   : > { %3924 = vst [vmem:[#allocation29_spill] sm:$0xff] %v3129_v29 }
  0xa8   : > { %v3056_v16 = vpop.f32.mrf.mxu1 }
  0xa9   : > { %1146 = vmatmul.f32.gmra.mxu0 %v2492_v53 }
  0xab   : > { %572 = vmatmul.f32.gmra.mxu1 %v2397_v13  ;;  %815 = vmatmul.f32.gmra.mxu2 %v3059_v38  ;;  %v2162_v13 = vld [vmem:[%s3828_s1 + $0x2c8] sm:$0xff] }
  0xac   : > { %1284 = vmatpush.msra.mxu1 %v2162_v13 }
  0xad   : > { %977 = vmatmul.f32.gmra.mxu3 %v2504_v57 }
  0xae   : > { %v3072_v20 = vpop.f32.mrf.mxu2  ;;  %v3074_v43 = vpop.f32.mrf.mxu0 }
  0xb0   : > { %v3079_v46 = vpop.f32.mrf.mxu1  ;;  %v3081_v33 = vpop.f32.mrf.mxu3 }
  0xb1   : > { %3920 = vst [vmem:[#allocation25_spill] sm:$0xff] %v3081_v33  ;;  %1149 = vmatmul.f32.gmra.mxu0 %v2573_v23  ;;  %v696_v33 = vrot.slane %v2734_v50, 2  ;;  %v698_v50 = vrot.slane %v2808_v10, 2 }
  0xb3   : > { %575 = vmatmul.f32.gmra.mxu1 %v2400_v14  ;;  %818 = vmatmul.f32.gmra.mxu2 %v3084_v52 }
  0xb5   : > { %980 = vmatmul.f32.gmra.mxu3 %v2507_v58 }
  0xb6   : > { %v3095_v49 = vpop.f32.mrf.mxu2  ;;  %v3097_v35 = vpop.f32.mrf.mxu0 }
  0xb8   : > { %v3099_v42 = vpop.f32.mrf.mxu1  ;;  %v3101_v14 = vpop.f32.mrf.mxu3 }
  0xb9   : > { %3921 = vst [vmem:[#allocation26_spill] sm:$0xff] %v3101_v14  ;;  %1152 = vmatmul.f32.gmra.mxu0 %v2642_v63  ;;  %v3149_v14 = vsel %vm662_vm1, %v693_v55, %v694_v22  ;;  %v2192_v55 = vld [vmem:[%s3828_s1 + $0x3b8] sm:$0xff] }
  0xba   : > { %3926 = vst [vmem:[#allocation31_spill] sm:$0xff] %v3149_v14  ;;  %1620 = vmatpush.msra.mxu3 %v2192_v55  ;;  %v699_v55 = vrot.slane %v2811_v12, 2 }
  0xbb   : > { %578 = vmatmul.f32.gmra.mxu1 %v2504_v57  ;;  %821 = vmatmul.f32.gmra.mxu2 %v3104_v40  ;;  %v2161_v57 = vld [vmem:[%s3828_s1 + $0x2c0] sm:$0xff] }
  0xbc   : > { %1285 = vmatpush.msra.mxu1 %v2161_v57  ;;  %v2209_v57 = vld [vmem:[%s3828_s1 + $0x440] sm:$0xff] }
  0xbd   : > { %983 = vmatmul.f32.gmra.mxu3 %v2648_v1  ;;  %1788 = vmatpush.msra.mxu0 %v2209_v57 }
  0xbe   : > { %v3117_v39 = vpop.f32.mrf.mxu2  ;;  %v3119_v13 = vpop.f32.mrf.mxu0 }
  0xc0   : > { %v3124_v44 = vpop.f32.mrf.mxu1  ;;  %v3126_v25 = vpop.f32.mrf.mxu3 }
  0xc1   : > { %3923 = vst [vmem:[#allocation28_spill] sm:$0xff] %v3126_v25  ;;  %1155 = vmatmul.f32.gmra.mxu0 %v2726_v47  ;;  %v2176_v47 = vld [vmem:[%s3828_s1 + $0x338] sm:$0xff] }
  0xc2   : > { %1448 = vmatpush.msra.mxu2 %v2176_v47  ;;  %v3174_v47 = vsel %vm662_vm1, %v694_v22, %v696_v33 }
  0xc3   : > { %581 = vmatmul.f32.gmra.mxu1 %v2507_v58  ;;  %824 = vmatmul.f32.gmra.mxu2 %v3129_v29  ;;  %3928 = vst [vmem:[#allocation33_spill] sm:$0xff] %v3174_v47 }
  0xc5   : > { %986 = vmatmul.f32.gmra.mxu3 %v2651_v2 }
  0xc6   : > { %v3140_v25 = vpop.f32.mrf.mxu2  ;;  %v3142_v45 = vpop.f32.mrf.mxu0 }
  0xc8   : > { %v3144_v37 = vpop.f32.mrf.mxu1  ;;  %v3146_v58 = vpop.f32.mrf.mxu3 }
  0xc9   : > { %3925 = vst [vmem:[#allocation30_spill] sm:$0xff] %v3146_v58  ;;  %1158 = vmatmul.f32.gmra.mxu0 %v2800_v6 }
  0xcb   : > { %584 = vmatmul.f32.gmra.mxu1 %v2648_v1  ;;  %827 = vmatmul.f32.gmra.mxu2 %v3149_v14  ;;  %v2160_v1 = vld [vmem:[%s3828_s1 + $0x2b8] sm:$0xff] }
  0xcc   : > { %1286 = vmatpush.msra.mxu1 %v2160_v1  ;;  %v3194_v1 = vsel %vm662_vm1, %v698_v50, %v699_v55  ;;  %v2191_v50 = vld [vmem:[%s3828_s1 + $0x3b0] sm:$0xff] }
  0xcd   : > { %989 = vmatmul.f32.gmra.mxu3 %v2808_v10  ;;  %3930 = vst [vmem:[#allocation35_spill] sm:$0xff] %v3194_v1 }
  0xce   : > { %v3162_v57 = vpop.f32.mrf.mxu2  ;;  %v3164_v58 = vpop.f32.mrf.mxu0  ;;  %1621 = vmatpush.msra.mxu3 %v2191_v50 }
  0xd0   : > { %v3169_v6 = vpop.f32.mrf.mxu1  ;;  %v3171_v14 = vpop.f32.mrf.mxu3 }
  0xd1   : > { %3927 = vst [vmem:[#allocation32_spill] sm:$0xff] %v3171_v14  ;;  %1161 = vmatmul.f32.gmra.mxu0 %v2880_v36  ;;  %v2208_v14 = vld [vmem:[%s3828_s1 + $0x438] sm:$0xff]  ;;  %v2175_v36 = vld [vmem:[%s3828_s1 + $0x330] sm:$0xff] }
  0xd2   : > { %1789 = vmatpush.msra.mxu0 %v2208_v14  ;;  %v701_v14 = vrot.slane %v2887_v11, 2  ;;  %1449 = vmatpush.msra.mxu2 %v2175_v36 }
  0xd3   : > { %587 = vmatmul.f32.gmra.mxu1 %v2651_v2  ;;  %830 = vmatmul.f32.gmra.mxu2 %v3174_v47  ;;  %v3229_v47 = vld [vmem:[%s2388_s14 + $0xc8] sm:$0xff] }
  0xd4   : > { %v3219_v36 = vsel %vm662_vm1, %v699_v55, %v701_v14  ;;  %v704_v63 = vrot.slane %v3229_v47, 2 }
  0xd5   : > { %992 = vmatmul.f32.gmra.mxu3 %v2811_v12  ;;  %3932 = vst [vmem:[#allocation37_spill] sm:$0xff] %v3219_v36 }
  0xd6   : > { %v3185_v29 = vpop.f32.mrf.mxu2  ;;  %v3187_v33 = vpop.f32.mrf.mxu0 }
  0xd8   : > { %v3189_v22 = vpop.f32.mrf.mxu1  ;;  %v3191_v2 = vpop.f32.mrf.mxu3 }
  0xd9   : > { %3929 = vst [vmem:[#allocation34_spill] sm:$0xff] %v3191_v2  ;;  %1164 = vmatmul.f32.gmra.mxu0 %v2925_v5  ;;  %v2159_v5 = vld [vmem:[%s3828_s1 + $0x2b0] sm:$0xff] }
  0xda   : > { %1287 = vmatpush.msra.mxu1 %v2159_v5  ;;  %v2207_v5 = vld [vmem:[%s3828_s1 + $0x430] sm:$0xff] }
  0xdb   : > { %590 = vmatmul.f32.gmra.mxu1 %v2808_v10  ;;  %833 = vmatmul.f32.gmra.mxu2 %v3194_v1 }
  0xdc   : > { %1790 = vmatpush.msra.mxu0 %v2207_v5 }
  0xdd   : > { %995 = vmatmul.f32.gmra.mxu3 %v2403_v15  ;;  %v3225_v15 = vld [vmem:[%s2388_s14 + $0xc0] sm:$0xff] }
  0xde   : > { %v3207_v2 = vpop.f32.mrf.mxu2  ;;  %v3209_v10 = vpop.f32.mrf.mxu0  ;;  %3933 = vst [vmem:[#allocation38_spill] sm:$0xff] %v3225_v15  ;;  %v703_v50 = vrot.slane %v3225_v15, 2 }
  0xe0   : > { %v3214_v1 = vpop.f32.mrf.mxu1  ;;  %v3216_v11 = vpop.f32.mrf.mxu3 }
  0xe1   : > { %3931 = vst [vmem:[#allocation36_spill] sm:$0xff] %v3216_v11  ;;  %1167 = vmatmul.f32.gmra.mxu0 %v2436_v31  ;;  %v3243_v31 = vsel %vm662_vm1, %v703_v50, %v704_v63  ;;  %v2190_v50 = vld [vmem:[%s3828_s1 + $0x3a8] sm:$0xff] }
  0xe2   : > { %3936 = vst [vmem:[#allocation41_spill] sm:$0xff] %v3243_v31  ;;  %1622 = vmatpush.msra.mxu3 %v2190_v50 }
  0xe3   : > { %593 = vmatmul.f32.gmra.mxu1 %v2811_v12  ;;  %836 = vmatmul.f32.gmra.mxu2 %v3219_v36  ;;  %v2174_v36 = vld [vmem:[%s3828_s1 + $0x328] sm:$0xff] }
  0xe4   : > { %1450 = vmatpush.msra.mxu2 %v2174_v36  ;;  %v708_v36 = vrot.slane %v2510_v59, 2 }
  0xe5   : > { %998 = vmatmul.f32.gmra.mxu3 %v3229_v47 }
  0xe6   : > { %v3236_v55 = vpop.f32.mrf.mxu2  ;;  %v3238_v14 = vpop.f32.mrf.mxu0 }
  0xe7   : > { %3934 = vst [vmem:[#allocation39_spill] sm:$0xff] %v3236_v55  ;;  %v706_v55 = vrot.slane %v2445_v34, 2 }
  0xe8   : > { %v3240_v12 = vpop.f32.mrf.mxu3  ;;  %v549_v11 = vpop.f32.mrf.mxu1 }
  0xe9   : > { %3935 = vst [vmem:[#allocation40_spill] sm:$0xff] %v3240_v12  ;;  %1170 = vmatmul.f32.gmra.mxu0 %v2495_v54  ;;  %v550_v5 = vadd.f32 %v549_v11, %v3074_v43  ;;  %v3261_v34 = vsel %vm662_vm1, %v704_v63, %v706_v55 }
  0xeb   : > { %596 = vmatmul.f32.gmra.mxu1 %v3225_v15  ;;  %839 = vmatmul.f32.gmra.mxu2 %v3243_v31  ;;  %v2158_v31 = vld [vmem:[%s3828_s1 + $0x2a8] sm:$0xff] }
  0xec   : > { %1288 = vmatpush.msra.mxu1 %v2158_v31  ;;  %v2206_v31 = vld [vmem:[%s3828_s1 + $0x428] sm:$0xff] }
  0xed   : > { %1001 = vmatmul.f32.gmra.mxu3 %v2510_v59  ;;  %1791 = vmatpush.msra.mxu0 %v2206_v31 }
  0xee   : > { %v792_v12 = vpop.f32.mrf.mxu2  ;;  %v1126_v54 = vpop.f32.mrf.mxu0 }
  0xef   : > { %v888_v15 = vadd.f32 %v792_v12, %v550_v5  ;;  %v709_v12 = vrot.slane %v2513_v60, 2 }
  0xf0   : > { %v552_v40 = vpop.f32.mrf.mxu1  ;;  %v954_v23 = vpop.f32.mrf.mxu3 }
  0xf1   : > { %v1050_v43 = vadd.f32 %v954_v23, %v888_v15  ;;  %1173 = vmatmul.f32.gmra.mxu0 %v2576_v24  ;;  %v553_v5 = vadd.f32 %v552_v40, %v3097_v35  ;;  %v3276_v50 = vsel %vm662_vm1, %v708_v36, %v709_v12  ;;  %v2173_v35 = vld [vmem:[%s3828_s1 + $0x320] sm:$0xff]  ;;  %v711_v40 = vrot.slane %v2582_v26, 2 }
  0xf2   : > { %1451 = vmatpush.msra.mxu2 %v2173_v35  ;;  %v2189_v36 = vld [vmem:[%s3828_s1 + $0x3a0] sm:$0xff]  ;;  %v714_v35 = vrot.slane %v2658_v4, 2 }
  0xf3   : > { %v3264_v11 = vadd.f32 %v1126_v54, %v1050_v43  ;;  %599 = vmatmul.f32.gmra.mxu1 %v3229_v47  ;;  %842 = vmatmul.f32.gmra.mxu2 %v3261_v34  ;;  %v3296_v26 = vsel %vm662_vm1, %v709_v12, %v711_v40  ;;  %v2205_v12 = vld [vmem:[%s3828_s1 + $0x420] sm:$0xff] }
  0xf4   : > { %1623 = vmatpush.msra.mxu3 %v2189_v36  ;;  %1792 = vmatpush.msra.mxu0 %v2205_v12 }
  0xf5   : > { %3937 = vst [vmem:[#allocation42_spill] sm:$0xff] %v3264_v11  ;;  %1004 = vmatmul.f32.gmra.mxu3 %v2513_v60 }
  0xf6   : > { %v795_v23 = vpop.f32.mrf.mxu2  ;;  %v1129_v63 = vpop.f32.mrf.mxu0 }
  0xf7   : > { %v889_v54 = vadd.f32 %v795_v23, %v553_v5 }
  0xf8   : > { %v555_v15 = vpop.f32.mrf.mxu1  ;;  %v957_v55 = vpop.f32.mrf.mxu3 }
  0xf9   : > { %v1051_v43 = vadd.f32 %v957_v55, %v889_v54  ;;  %1176 = vmatmul.f32.gmra.mxu0 %v2645_v0  ;;  %v556_v5 = vadd.f32 %v555_v15, %v3119_v13 }
  0xfb   : > { %v3279_v11 = vadd.f32 %v1129_v63, %v1051_v43  ;;  %602 = vmatmul.f32.gmra.mxu1 %v2510_v59  ;;  %845 = vmatmul.f32.gmra.mxu2 %v3276_v50  ;;  %v2157_v63 = vld [vmem:[%s3828_s1 + $0x2a0] sm:$0xff]  ;;  %v713_v43 = vrot.slane %v2654_v3, 2 }
  0xfc   : > { %1289 = vmatpush.msra.mxu1 %v2157_v63 }
  0xfd   : > { %1007 = vmatmul.f32.gmra.mxu3 %v2654_v3 }
  0xfe   : > { %v798_v31 = vpop.f32.mrf.mxu2  ;;  %v1132_v23 = vpop.f32.mrf.mxu0 }
  0xff   : > { %v890_v59 = vadd.f32 %v798_v31, %v556_v5 }
 0x100   : > { %v558_v54 = vpop.f32.mrf.mxu1  ;;  %v960_v55 = vpop.f32.mrf.mxu3 }
 0x101   : > { %v1052_v13 = vadd.f32 %v960_v55, %v890_v59  ;;  %1179 = vmatmul.f32.gmra.mxu0 %v2731_v48  ;;  %v559_v5 = vadd.f32 %v558_v54, %v3142_v45  ;;  %v3311_v59 = vsel %vm662_vm1, %v713_v43, %v714_v35  ;;  %v2172_v45 = vld [vmem:[%s3828_s1 + $0x318] sm:$0xff]  ;;  %v716_v54 = vrot.slane %v2738_v51, 2 }
 0x102   : > { %1452 = vmatpush.msra.mxu2 %v2172_v45  ;;  %v3938_v43 = vld [vmem:[#allocation13_spill] sm:$0xff] }
 0x103   : > { %v3299_v15 = vadd.f32 %v1132_v23, %v1052_v13  ;;  %605 = vmatmul.f32.gmra.mxu1 %v2513_v60  ;;  %848 = vmatmul.f32.gmra.mxu2 %v3296_v26  ;;  %v3331_v51 = vsel %vm662_vm1, %v714_v35, %v716_v54  ;;  %v718_v45 = vrot.slane %v3938_v43, 2  ;;  %v2204_v35 = vld [vmem:[%s3828_s1 + $0x418] sm:$0xff] }
 0x104   : > { %1793 = vmatpush.msra.mxu0 %v2204_v35  ;;  %v3943_v35 = vld [vmem:[#allocation20_spill] sm:$0xff] }
 0x105   : > { %1010 = vmatmul.f32.gmra.mxu3 %v2658_v4 }
 0x106   : > { %v801_v40 = vpop.f32.mrf.mxu2  ;;  %v1135_v36 = vpop.f32.mrf.mxu0 }
 0x107   : > { %v891_v31 = vadd.f32 %v801_v40, %v559_v5  ;;  %v2188_v5 = vld [vmem:[%s3828_s1 + $0x398] sm:$0xff] }
 0x108   : > { %v561_v23 = vpop.f32.mrf.mxu1  ;;  %v963_v60 = vpop.f32.mrf.mxu3  ;;  %1624 = vmatpush.msra.mxu3 %v2188_v5 }
 0x109   : > { %v1053_v63 = vadd.f32 %v963_v60, %v891_v31  ;;  %1182 = vmatmul.f32.gmra.mxu0 %v2805_v9  ;;  %v562_v13 = vadd.f32 %v561_v23, %v3164_v58  ;;  %v3939_v23 = vld [vmem:[#allocation19_spill] sm:$0xff] }
 0x10b   : > { %v3314_v55 = vadd.f32 %v1135_v36, %v1053_v63  ;;  %608 = vmatmul.f32.gmra.mxu1 %v2654_v3  ;;  %851 = vmatmul.f32.gmra.mxu2 %v3311_v59  ;;  %v2156_v36 = vld [vmem:[%s3828_s1 + $0x298] sm:$0xff] }
 0x10c   : > { %1290 = vmatpush.msra.mxu1 %v2156_v36 }
 0x10d   : > { %1013 = vmatmul.f32.gmra.mxu3 %v3938_v43 }
 0x10e   : > { %v804_v12 = vpop.f32.mrf.mxu2  ;;  %v1138_v40 = vpop.f32.mrf.mxu0 }
 0x10f   : > { %v892_v3 = vadd.f32 %v804_v12, %v562_v13  ;;  %v3941_v13 = vld [vmem:[#allocation14_spill] sm:$0xff] }
 0x110   : > { %v564_v31 = vpop.f32.mrf.mxu1  ;;  %v966_v60 = vpop.f32.mrf.mxu3  ;;  %v719_v5 = vrot.slane %v3941_v13, 2 }
 0x111   : > { %v1054_v58 = vadd.f32 %v966_v60, %v892_v3  ;;  %1185 = vmatmul.f32.gmra.mxu0 %v3939_v23  ;;  %v565_v12 = vadd.f32 %v564_v31, %v3187_v33  ;;  %v2171_v31 = vld [vmem:[%s3828_s1 + $0x310] sm:$0xff] }
 0x112   : > { %v3346_v60 = vsel %vm662_vm1, %v718_v45, %v719_v5  ;;  %1453 = vmatpush.msra.mxu2 %v2171_v31  ;;  %v3359_v45 = vld [vmem:[%s2388_s14 + $0x120] sm:$0xff] }
 0x113   : > { %v3334_v63 = vadd.f32 %v1138_v40, %v1054_v58  ;;  %611 = vmatmul.f32.gmra.mxu1 %v2658_v4  ;;  %854 = vmatmul.f32.gmra.mxu2 %v3331_v51 }
 0x115   : > { %3940 = vst [vmem:[#allocation13_spill] sm:$0xff] %v3334_v63  ;;  %1016 = vmatmul.f32.gmra.mxu3 %v3941_v13 }
 0x116   : > { %v807_v54 = vpop.f32.mrf.mxu2  ;;  %v1141_v40 = vpop.f32.mrf.mxu0 }
 0x117   : > { %v893_v3 = vadd.f32 %v807_v54, %v565_v12  ;;  %v721_v12 = vrot.slane %v3943_v35, 2 }
 0x118   : > { %v567_v4 = vpop.f32.mrf.mxu1  ;;  %v969_v36 = vpop.f32.mrf.mxu3 }
 0x119   : > { %v1055_v58 = vadd.f32 %v969_v36, %v893_v3  ;;  %1188 = vmatmul.f32.gmra.mxu0 %v2928_v56  ;;  %v568_v54 = vadd.f32 %v567_v4, %v3209_v10  ;;  %v3369_v10 = vsel %vm662_vm1, %v719_v5, %v721_v12  ;;  %v2203_v5 = vld [vmem:[%s3828_s1 + $0x410] sm:$0xff] }
 0x11a   : > { %1794 = vmatpush.msra.mxu0 %v2203_v5  ;;  %v2282_v5 = vld [vmem:[%s2388_s14 + $0x130] sm:$0x3] }
 0x11b   : > { %v3349_v33 = vadd.f32 %v1141_v40, %v1055_v58  ;;  %614 = vmatmul.f32.gmra.mxu1 %v3938_v43  ;;  %857 = vmatmul.f32.gmra.mxu2 %v3346_v60  ;;  %v2187_v40 = vld [vmem:[%s3828_s1 + $0x390] sm:$0xff] }
 0x11c   : > { %1625 = vmatpush.msra.mxu3 %v2187_v40  ;;  %v2155_v58 = vld [vmem:[%s3828_s1 + $0x290] sm:$0xff]  ;;  %v3378_v40 = vld [vmem:[%s2388_s14 + $0x128] sm:$0xff] }
 0x11d   : > { %3942 = vst [vmem:[#allocation19_spill] sm:$0xff] %v3349_v33  ;;  %1019 = vmatmul.f32.gmra.mxu3 %v3359_v45  ;;  %1291 = vmatpush.msra.mxu1 %v2155_v58  ;;  %v3944_v33 = vld [vmem:[#allocation3_spill] sm:$0xff] }
 0x11e   : > { %v810_v43 = vpop.f32.mrf.mxu2  ;;  %v1144_v3 = vpop.f32.mrf.mxu0 }
 0x11f   : > { %v894_v36 = vadd.f32 %v810_v43, %v568_v54  ;;  %v723_v54 = vrot.slane %v3359_v45, 2  ;;  %v724_v43 = vrot.slane %v3378_v40, 2 }
 0x120   : > { %v570_v31 = vpop.f32.mrf.mxu1  ;;  %v972_v35 = vpop.f32.mrf.mxu3 }
 0x121   : > { %v1056_v4 = vadd.f32 %v972_v35, %v894_v36  ;;  %1191 = vmatmul.f32.gmra.mxu0 %v3944_v33  ;;  %v571_v56 = vadd.f32 %v570_v31, %v3238_v14  ;;  %v3387_v35 = vsel %vm662_vm1, %v723_v54, %v724_v43  ;;  %v2170_v31 = vld [vmem:[%s3828_s1 + $0x308] sm:$0xff]  ;;  %v3400_v54 = vld [vmem:[%s2388_s14 + $0x138] sm:$0xff] }
 0x122   : > { %3946 = vst [vmem:[#allocation20_spill] sm:$0xff] %v3387_v35  ;;  %1454 = vmatpush.msra.mxu2 %v2170_v31 }
 0x123   : > { %v3372_v63 = vadd.f32 %v1144_v3, %v1056_v4  ;;  %617 = vmatmul.f32.gmra.mxu1 %v3941_v13  ;;  %860 = vmatmul.f32.gmra.mxu2 %v3369_v10  ;;  %3949 = vst [vmem:[#allocation44_spill] sm:$0xff] %v3400_v54 }
 0x125   : > { %3945 = vst [vmem:[#allocation14_spill] sm:$0xff] %v3372_v63  ;;  %1022 = vmatmul.f32.gmra.mxu3 %v3378_v40  ;;  %v3947_v63 = vld [vmem:[#allocation5_spill] sm:$0xff] }
 0x126   : > { %v813_v12 = vpop.f32.mrf.mxu2  ;;  %v1147_v3 = vpop.f32.mrf.mxu0 }
 0x127   : > { %v895_v13 = vadd.f32 %v813_v12, %v571_v56  ;;  %v726_v56 = vrot.slane %v2282_v5, 2  ;;  %v2154_v5 = vld [vmem:[%s3828_s1 + $0x288] sm:$0xff] }
 0x128   : > { %v573_v36 = vpop.f32.mrf.mxu1  ;;  %v975_v58 = vpop.f32.mrf.mxu3  ;;  %1292 = vmatpush.msra.mxu1 %v2154_v5 }
 0x129   : > { %v1057_v4 = vadd.f32 %v975_v58, %v895_v13  ;;  %1194 = vmatmul.f32.gmra.mxu0 %v3947_v63  ;;  %v574_v12 = vadd.f32 %v573_v36, %v3056_v16  ;;  %v3410_v16 = vsel %vm662_vm1, %v724_v43, %v726_v56  ;;  %v3951_v63 = vld [vmem:[#allocation7_spill] sm:$0xff] }
 0x12a   : > { %3950 = vst [vmem:[#allocation45_spill] sm:$0xff] %v3410_v16  ;;  %v2202_v43 = vld [vmem:[%s3828_s1 + $0x408] sm:$0xff] }
 0x12b   : > { %v3390_v14 = vadd.f32 %v1147_v3, %v1057_v4  ;;  %620 = vmatmul.f32.gmra.mxu1 %v3359_v45  ;;  %863 = vmatmul.f32.gmra.mxu2 %v3387_v35  ;;  %v2186_v3 = vld [vmem:[%s3828_s1 + $0x388] sm:$0xff] }
 0x12c   : > { %1626 = vmatpush.msra.mxu3 %v2186_v3  ;;  %v3419_v3 = vld [vmem:[%s2388_s14 + $0x140] sm:$0xff]  ;;  %1795 = vmatpush.msra.mxu0 %v2202_v43  ;;  %v2285_v43 = vld [vmem:[%s2388_s14 + $0x148] sm:$0x3] }
 0x12d   : > { %3948 = vst [vmem:[#allocation43_spill] sm:$0xff] %v3390_v14  ;;  %1025 = vmatmul.f32.gmra.mxu3 %v3400_v54 }
 0x12e   : > { %v816_v13 = vpop.f32.mrf.mxu2  ;;  %v1150_v58 = vpop.f32.mrf.mxu0  ;;  %3953 = vst [vmem:[#allocation47_spill] sm:$0xff] %v3419_v3 }
 0x12f   : > { %v896_v4 = vadd.f32 %v816_v13, %v574_v12  ;;  %v728_v12 = vrot.slane %v3400_v54, 2  ;;  %v729_v13 = vrot.slane %v3419_v3, 2 }
 0x130   : > { %v576_v31 = vpop.f32.mrf.mxu1  ;;  %v978_v14 = vpop.f32.mrf.mxu3 }
 0x131   : > { %v1058_v36 = vadd.f32 %v978_v14, %v896_v4  ;;  %1197 = vmatmul.f32.gmra.mxu0 %v3951_v63  ;;  %v577_v33 = vadd.f32 %v576_v31, %v3079_v46  ;;  %v3955_v63 = vld [vmem:[#allocation9_spill] sm:$0xff]  ;;  %v2169_v31 = vld [vmem:[%s3828_s1 + $0x300] sm:$0xff] }
 0x132   : > { %1455 = vmatpush.msra.mxu2 %v2169_v31 }
 0x133   : > { %v3413_v35 = vadd.f32 %v1150_v58, %v1058_v36  ;;  %623 = vmatmul.f32.gmra.mxu1 %v3378_v40  ;;  %866 = vmatmul.f32.gmra.mxu2 %v3410_v16  ;;  %v3428_v36 = vsel %vm662_vm1, %v728_v12, %v729_v13  ;;  %v3441_v12 = vld [vmem:[%s2388_s14 + $0x150] sm:$0xff] }
 0x134   : > { %3954 = vst [vmem:[#allocation48_spill] sm:$0xff] %v3428_v36 }
 0x135   : > { %3952 = vst [vmem:[#allocation46_spill] sm:$0xff] %v3413_v35  ;;  %1028 = vmatmul.f32.gmra.mxu3 %v3419_v3 }
 0x136   : > { %v819_v14 = vpop.f32.mrf.mxu2  ;;  %v1153_v56 = vpop.f32.mrf.mxu0 }
 0x137   : > { %v897_v58 = vadd.f32 %v819_v14, %v577_v33  ;;  %v731_v33 = vrot.slane %v2285_v43, 2  ;;  %v2153_v43 = vld [vmem:[%s3828_s1 + $0x280] sm:$0xff] }
 0x138   : > { %v579_v4 = vpop.f32.mrf.mxu1  ;;  %v981_v5 = vpop.f32.mrf.mxu3  ;;  %1293 = vmatpush.msra.mxu1 %v2153_v43 }
 0x139   : > { %v1059_v35 = vadd.f32 %v981_v5, %v897_v58  ;;  %1200 = vmatmul.f32.gmra.mxu0 %v3955_v63  ;;  %v580_v14 = vadd.f32 %v579_v4, %v3099_v42  ;;  %v3451_v42 = vsel %vm662_vm1, %v729_v13, %v731_v33  ;;  %v3958_v63 = vld [vmem:[#allocation11_spill] sm:$0xff] }
 0x13a   : > { %3957 = vst [vmem:[#allocation50_spill] sm:$0xff] %v3451_v42 }
 0x13b   : > { %v3431_v46 = vadd.f32 %v1153_v56, %v1059_v35  ;;  %626 = vmatmul.f32.gmra.mxu1 %v3400_v54  ;;  %869 = vmatmul.f32.gmra.mxu2 %v3428_v36  ;;  %v2185_v35 = vld [vmem:[%s3828_s1 + $0x380] sm:$0xff] }
 0x13c   : > { %1627 = vmatpush.msra.mxu3 %v2185_v35  ;;  %v3460_v35 = vld [vmem:[%s2388_s14 + $0x158] sm:$0xff] }
 0x13d   : > { %3956 = vst [vmem:[#allocation49_spill] sm:$0xff] %v3431_v46  ;;  %1031 = vmatmul.f32.gmra.mxu3 %v3441_v12 }
 0x13e   : > { %v822_v56 = vpop.f32.mrf.mxu2  ;;  %v1156_v58 = vpop.f32.mrf.mxu0 }
 0x13f   : > { %v898_v5 = vadd.f32 %v822_v56, %v580_v14  ;;  %v733_v14 = vrot.slane %v3441_v12, 2  ;;  %v734_v56 = vrot.slane %v3460_v35, 2 }
 0x140   : > { %v582_v31 = vpop.f32.mrf.mxu1  ;;  %v984_v46 = vpop.f32.mrf.mxu3 }
 0x141   : > { %v1060_v4 = vadd.f32 %v984_v46, %v898_v5  ;;  %1203 = vmatmul.f32.gmra.mxu0 %v3958_v63  ;;  %v583_v13 = vadd.f32 %v582_v31, %v3124_v44  ;;  %v2201_v46 = vld [vmem:[%s3828_s1 + $0x400] sm:$0xff] }
 0x142   : > { %1796 = vmatpush.msra.mxu0 %v2201_v46  ;;  %v2288_v44 = vld [vmem:[%s2388_s14 + $0x160] sm:$0x3] }
 0x143   : > { %v3454_v36 = vadd.f32 %v1156_v58, %v1060_v4  ;;  %629 = vmatmul.f32.gmra.mxu1 %v3419_v3  ;;  %872 = vmatmul.f32.gmra.mxu2 %v3451_v42  ;;  %v3960_v42 = vld [vmem:[#allocation15_spill] sm:$0xff]  ;;  %v736_v31 = vrot.slane %v2288_v44, 2  ;;  %v3966_v44 = vld [vmem:[#allocation17_spill] sm:$0xff] }
 0x145   : > { %3959 = vst [vmem:[#allocation51_spill] sm:$0xff] %v3454_v36  ;;  %1034 = vmatmul.f32.gmra.mxu3 %v3460_v35  ;;  %v3469_v36 = vsel %vm662_vm1, %v733_v14, %v734_v56 }
 0x146   : > { %v825_v33 = vpop.f32.mrf.mxu2  ;;  %v1159_v58 = vpop.f32.mrf.mxu0 }
 0x147   : > { %v899_v5 = vadd.f32 %v825_v33, %v583_v13  ;;  %v3962_v13 = vld [vmem:[#allocation16_spill] sm:$0xff] }
 0x148   : > { %v585_v43 = vpop.f32.mrf.mxu1  ;;  %v987_v4 = vpop.f32.mrf.mxu3 }
 0x149   : > { %v1061_v63 = vadd.f32 %v987_v4, %v899_v5  ;;  %1206 = vmatmul.f32.gmra.mxu0 %v3960_v42  ;;  %v586_v46 = vadd.f32 %v585_v43, %v3144_v37  ;;  %v3964_v4 = vld [vmem:[#allocation21_spill] sm:$0xff]  ;;  %v3488_v37 = vld [vmem:[%s2388_s14 + $0x168] sm:$0xff] }
 0x14a   : > { %v738_v43 = vrot.slane %v3488_v37, 2 }
 0x14b   : > { %v3472_v3 = vadd.f32 %v1159_v58, %v1061_v63  ;;  %632 = vmatmul.f32.gmra.mxu1 %v3441_v12  ;;  %875 = vmatmul.f32.gmra.mxu2 %v3469_v36  ;;  %v3480_v63 = vsel %vm662_vm1, %v734_v56, %v736_v31 }
 0x14c   : > { %3963 = vst [vmem:[#allocation16_spill] sm:$0xff] %v3480_v63 }
 0x14d   : > { %3961 = vst [vmem:[#allocation15_spill] sm:$0xff] %v3472_v3  ;;  %1037 = vmatmul.f32.gmra.mxu3 %v3962_v13 }
 0x14e   : > { %v828_v33 = vpop.f32.mrf.mxu2  ;;  %v1162_v54 = vpop.f32.mrf.mxu0 }
 0x14f   : > { %v900_v14 = vadd.f32 %v828_v33, %v586_v46  ;;  %v739_v46 = vrot.slane %v3966_v44, 2 }
 0x150   : > { %v588_v16 = vpop.f32.mrf.mxu1  ;;  %v990_v5 = vpop.f32.mrf.mxu3 }
 0x151   : > { %v1062_v58 = vadd.f32 %v990_v5, %v900_v14  ;;  %1209 = vmatmul.f32.gmra.mxu0 %v3964_v4  ;;  %v589_v13 = vadd.f32 %v588_v16, %v3169_v6  ;;  %v3501_v4 = vld [vmem:[%s2388_s14 + $0x180] sm:$0xff] }
 0x152   : > { %v1102_v6 = vrot.slane %v3501_v4, 1 }
 0x153   : > { %v3483_v3 = vadd.f32 %v1162_v54, %v1062_v58  ;;  %635 = vmatmul.f32.gmra.mxu1 %v3460_v35  ;;  %878 = vmatmul.f32.gmra.mxu2 %v3480_v63  ;;  %v3495_v54 = vld [vmem:[%s2388_s14 + $0x188] sm:$0xff]  ;;  %v3498_v58 = vsel %vm662_vm1, %v738_v43, %v739_v46  ;;  %v741_v43 = vrot.slane %v2903_v7, 2  ;;  %v3517_v63 = vld [vmem:[%s2388_s14 + $0x190] sm:$0x3] }
 0x154   : > { %3967 = vst [vmem:[#allocation17_spill] sm:$0xff] %v3498_v58  ;;  %v1103_v16 = vrot.slane %v3495_v54, 1  ;;  %v1105_v7 = vrot.slane %v3517_v63, 1 }
 0x155   : > { %3965 = vst [vmem:[#allocation52_spill] sm:$0xff] %v3483_v3  ;;  %1040 = vmatmul.f32.gmra.mxu3 %v3966_v44 }
 0x156   : > { %v831_v56 = vpop.f32.mrf.mxu2  ;;  %v1165_v31 = vpop.f32.mrf.mxu0  ;;  %3969 = vst [vmem:[#allocation54_spill] sm:$0xff] %v3517_v63 }
 0x157   : > { %v901_v33 = vadd.f32 %v831_v56, %v589_v13 }
 0x158   : > { %v591_v14 = vpop.f32.mrf.mxu1  ;;  %v993_v5 = vpop.f32.mrf.mxu3 }
 0x159   : > { %v1063_v3 = vadd.f32 %v993_v5, %v901_v33  ;;  %1212 = vmatmul.f32.gmra.mxu0 %v2932_v8  ;;  %v592_v13 = vadd.f32 %v591_v14, %v3189_v22  ;;  %v3514_v5 = vsel %vm306_vm0, %v1102_v6, %v1103_v16  ;;  %v3527_v14 = vld [vmem:[%s2388_s14 + $0x170] sm:$0xff] }
 0x15b   : > { %v3506_v44 = vadd.f32 %v1165_v31, %v1063_v3  ;;  %638 = vmatmul.f32.gmra.mxu1 %v3488_v37  ;;  %881 = vmatmul.f32.gmra.mxu2 %v3498_v58 }
 0x15d   : > { %3968 = vst [vmem:[#allocation53_spill] sm:$0xff] %v3506_v44  ;;  %1043 = vmatmul.f32.gmra.mxu3 %v3501_v4  ;;  %v3520_v44 = vsel %vm662_vm1, %v739_v46, %v741_v43 }
 0x15e   : > { %v834_v56 = vpop.f32.mrf.mxu2  ;;  %v1168_v33 = vpop.f32.mrf.mxu0 }
 0x15f   : > { %v902_v8 = vadd.f32 %v834_v56, %v592_v13 }
 0x160   : > { %v594_v3 = vpop.f32.mrf.mxu1  ;;  %v996_v31 = vpop.f32.mrf.mxu3 }
 0x161   : > { %v1064_v58 = vadd.f32 %v996_v31, %v902_v8  ;;  %1215 = vmatmul.f32.gmra.mxu0 %v3514_v5  ;;  %v595_v6 = vadd.f32 %v594_v3, %v3214_v1  ;;  %v3534_v8 = vsel %vm306_vm0, %v1103_v16, %v1105_v7 }
 0x163   : > { %v3524_v22 = vadd.f32 %v1168_v33, %v1064_v58  ;;  %641 = vmatmul.f32.gmra.mxu1 %v3527_v14  ;;  %884 = vmatmul.f32.gmra.mxu2 %v3520_v44 }
 0x165   : > { %3970 = vst [vmem:[#allocation55_spill] sm:$0xff] %v3524_v22  ;;  %1046 = vmatmul.f32.gmra.mxu3 %v3495_v54  ;;  %v2291_v22 = vld [vmem:[%s2388_s14 + $0x30] sm:$0xff] }
 0x166   : > { %v837_v46 = vpop.f32.mrf.mxu2  ;;  %v1171_v43 = vpop.f32.mrf.mxu0 }
 0x167   : > { %v903_v13 = vadd.f32 %v837_v46, %v595_v6 }
 0x168   : > { %v597_v56 = vpop.f32.mrf.mxu1  ;;  %v999_v58 = vpop.f32.mrf.mxu3 }
 0x169   : > { %v1065_v33 = vadd.f32 %v999_v58, %v903_v13  ;;  %1218 = vmatmul.f32.gmra.mxu0 %v3534_v8  ;;  %v598_v1 = vadd.f32 %v597_v56, %v3072_v20 }
 0x16b   : > { %v3537_v31 = vadd.f32 %v1171_v43, %v1065_v33  ;;  %1294 = vmatmul.f32.vlgmr.msra.gmra.mxu1 %v2970_v32  ;;  %1456 = vmatmul.f32.vlgmr.msra.gmra.mxu2 %v2291_v22  ;;  %v2292_v32 = vld [vmem:[%s2388_s14 + $0x38] sm:$0xff] }
 0x16d   : > { %1628 = vmatmul.f32.vlgmr.msra.gmra.mxu3 %v2783_v41 }
 0x16e   : > { %v840_v3 = vpop.f32.mrf.mxu2  ;;  %v1174_v16 = vpop.f32.mrf.mxu0 }
 0x16f   : > { %v904_v7 = vadd.f32 %v840_v3, %v598_v1 }
 0x170   : > { %v600_v6 = vpop.f32.mrf.mxu1  ;;  %v1002_v46 = vpop.f32.mrf.mxu3 }
 0x171   : > { %v1066_v63 = vadd.f32 %v1002_v46, %v904_v7  ;;  %1797 = vmatmul.f32.vlgmr.msra.gmra.mxu0 %v2999_v62  ;;  %v601_v22 = vadd.f32 %v600_v6, %v3095_v49 }
 0x173   : > { %v3544_v13 = vadd.f32 %v1174_v16, %v1066_v63  ;;  %1297 = vmatmul.f32.gmra.mxu1 %v2987_v21  ;;  %1459 = vmatmul.f32.gmra.mxu2 %v2292_v32  ;;  %v2293_v21 = vld [vmem:[%s2388_s14 + $0x48] sm:$0xff] }
 0x175   : > { %1631 = vmatmul.f32.gmra.mxu3 %v2866_v18 }
 0x176   : > { %v843_v41 = vpop.f32.mrf.mxu2  ;;  %v1177_v20 = vpop.f32.mrf.mxu0 }
 0x177   : > { %v905_v43 = vadd.f32 %v843_v41, %v601_v22 }
 0x178   : > { %v603_v56 = vpop.f32.mrf.mxu1  ;;  %v1005_v58 = vpop.f32.mrf.mxu3 }
 0x179   : > { %v1067_v33 = vadd.f32 %v1005_v58, %v905_v43  ;;  %1800 = vmatmul.f32.gmra.mxu0 %v3016_v28  ;;  %v604_v63 = vadd.f32 %v603_v56, %v3117_v39 }
 0x17b   : > { %v3551_v1 = vadd.f32 %v1177_v20, %v1067_v33  ;;  %1300 = vmatmul.f32.gmra.mxu1 %v2999_v62  ;;  %1462 = vmatmul.f32.gmra.mxu2 %v2293_v21  ;;  %v2294_v62 = vld [vmem:[%s2388_s14 + $0x50] sm:$0xff] }
 0x17d   : > { %1634 = vmatmul.f32.gmra.mxu3 %v2918_v19 }
 0x17e   : > { %v846_v18 = vpop.f32.mrf.mxu2  ;;  %v1180_v49 = vpop.f32.mrf.mxu0 }
 0x17f   : > { %v906_v3 = vadd.f32 %v846_v18, %v604_v63 }
 0x180   : > { %v606_v16 = vpop.f32.mrf.mxu1  ;;  %v1008_v7 = vpop.f32.mrf.mxu3 }
 0x181   : > { %v1068_v6 = vadd.f32 %v1008_v7, %v906_v3  ;;  %1803 = vmatmul.f32.gmra.mxu0 %v3028_v27  ;;  %v607_v32 = vadd.f32 %v606_v16, %v3140_v25 }
 0x183   : > { %v3558_v46 = vadd.f32 %v1180_v49, %v1068_v6  ;;  %1303 = vmatmul.f32.gmra.mxu1 %v3016_v28  ;;  %1465 = vmatmul.f32.gmra.mxu2 %v2294_v62  ;;  %v2295_v28 = vld [vmem:[%s2388_s14 + $0x60] sm:$0xff] }
 0x185   : > { %1637 = vmatmul.f32.gmra.mxu3 %v2944_v61 }
 0x186   : > { %v849_v19 = vpop.f32.mrf.mxu2  ;;  %v1183_v39 = vpop.f32.mrf.mxu0 }
 0x187   : > { %v907_v22 = vadd.f32 %v849_v19, %v607_v32 }
 0x188   : > { %v609_v41 = vpop.f32.mrf.mxu1  ;;  %v1011_v20 = vpop.f32.mrf.mxu3 }
 0x189   : > { %v1069_v43 = vadd.f32 %v1011_v20, %v907_v22  ;;  %1806 = vmatmul.f32.gmra.mxu0 %v3045_v17  ;;  %v610_v58 = vadd.f32 %v609_v41, %v3162_v57 }
 0x18b   : > { %v3565_v56 = vadd.f32 %v1183_v39, %v1069_v43  ;;  %1306 = vmatmul.f32.gmra.mxu1 %v3028_v27  ;;  %1468 = vmatmul.f32.gmra.mxu2 %v2295_v28  ;;  %v2296_v27 = vld [vmem:[%s2388_s14 + $0x68] sm:$0xff] }
 0x18c   : > { %v3972_v28 = vld [vmem:[#allocation27_spill] sm:$0xff] }
 0x18d   : > { %1640 = vmatmul.f32.gmra.mxu3 %v2433_v30 }
 0x18e   : > { %v852_v61 = vpop.f32.mrf.mxu2  ;;  %v1186_v25 = vpop.f32.mrf.mxu0 }
 0x18f   : > { %v908_v33 = vadd.f32 %v852_v61, %v610_v58  ;;  %v3973_v61 = vld [vmem:[#allocation39_spill] sm:$0xff] }
 0x190   : > { %v612_v21 = vpop.f32.mrf.mxu1  ;;  %v1014_v63 = vpop.f32.mrf.mxu3 }
 0x191   : > { %v1070_v18 = vadd.f32 %v1014_v63, %v908_v33  ;;  %1809 = vmatmul.f32.gmra.mxu0 %v3059_v38  ;;  %v613_v3 = vadd.f32 %v612_v21, %v3185_v29  ;;  %v3971_v29 = vld [vmem:[#allocation6_spill] sm:$0xff] }
 0x193   : > { %v3572_v49 = vadd.f32 %v1186_v25, %v1070_v18  ;;  %1309 = vmatmul.f32.gmra.mxu1 %v3045_v17  ;;  %1471 = vmatmul.f32.gmra.mxu2 %v2296_v27  ;;  %v2297_v17 = vld [vmem:[%s2388_s14 + $0x78] sm:$0xff] }
 0x195   : > { %1643 = vmatmul.f32.gmra.mxu3 %v2492_v53 }
 0x196   : > { %v855_v30 = vpop.f32.mrf.mxu2  ;;  %v1189_v57 = vpop.f32.mrf.mxu0 }
 0x197   : > { %v909_v16 = vadd.f32 %v855_v30, %v613_v3  ;;  %v3975_v30 = vld [vmem:[#allocation29_spill] sm:$0xff] }
 0x198   : > { %v615_v7 = vpop.f32.mrf.mxu1  ;;  %v1017_v6 = vpop.f32.mrf.mxu3 }
 0x199   : > { %v1071_v62 = vadd.f32 %v1017_v6, %v909_v16  ;;  %1812 = vmatmul.f32.gmra.mxu0 %v3084_v52  ;;  %v616_v19 = vadd.f32 %v615_v7, %v3207_v2  ;;  %v3974_v2 = vld [vmem:[#allocation8_spill] sm:$0xff]  ;;  %v3976_v16 = vld [vmem:[#allocation25_spill] sm:$0xff]  ;;  %v3977_v6 = vld [vmem:[#allocation10_spill] sm:$0xff] }
 0x19b   : > { %v3579_v32 = vadd.f32 %v1189_v57, %v1071_v62  ;;  %1312 = vmatmul.f32.gmra.mxu1 %v3059_v38  ;;  %1474 = vmatmul.f32.gmra.mxu2 %v2297_v17  ;;  %v2298_v38 = vld [vmem:[%s2388_s14 + $0x80] sm:$0xff] }
 0x19d   : > { %1646 = vmatmul.f32.gmra.mxu3 %v3971_v29 }
 0x19e   : > { %v858_v53 = vpop.f32.mrf.mxu2  ;;  %v1192_v39 = vpop.f32.mrf.mxu0 }
 0x19f   : > { %v910_v22 = vadd.f32 %v858_v53, %v616_v19 }
 0x1a0   : > { %v618_v41 = vpop.f32.mrf.mxu1  ;;  %v1020_v20 = vpop.f32.mrf.mxu3 }
 0x1a1   : > { %v1072_v43 = vadd.f32 %v1020_v20, %v910_v22  ;;  %1815 = vmatmul.f32.gmra.mxu0 %v3972_v28  ;;  %v619_v25 = vadd.f32 %v618_v41, %v3973_v61  ;;  %v3978_v22 = vld [vmem:[#allocation31_spill] sm:$0xff]  ;;  %v2300_v20 = vld [vmem:[%s2388_s14 + $0x98] sm:$0xff] }
 0x1a3   : > { %v3586_v58 = vadd.f32 %v1192_v39, %v1072_v43  ;;  %1315 = vmatmul.f32.gmra.mxu1 %v3084_v52  ;;  %1477 = vmatmul.f32.gmra.mxu2 %v2298_v38  ;;  %v2299_v52 = vld [vmem:[%s2388_s14 + $0x90] sm:$0xff]  ;;  %v3979_v43 = vld [vmem:[#allocation26_spill] sm:$0xff] }
 0x1a4   : > { %v3980_v38 = vld [vmem:[#allocation12_spill] sm:$0xff] }
 0x1a5   : > { %1649 = vmatmul.f32.gmra.mxu3 %v3974_v2 }
 0x1a6   : > { %v861_v33 = vpop.f32.mrf.mxu2  ;;  %v1195_v21 = vpop.f32.mrf.mxu0 }
 0x1a7   : > { %v911_v63 = vadd.f32 %v861_v33, %v619_v25 }
 0x1a8   : > { %v621_v18 = vpop.f32.mrf.mxu1  ;;  %v1023_v27 = vpop.f32.mrf.mxu3 }
 0x1a9   : > { %v1073_v3 = vadd.f32 %v1023_v27, %v911_v63  ;;  %1818 = vmatmul.f32.gmra.mxu0 %v3975_v30  ;;  %v622_v7 = vadd.f32 %v621_v18, %v3976_v16  ;;  %v3981_v18 = vld [vmem:[#allocation33_spill] sm:$0xff]  ;;  %v3983_v16 = vld [vmem:[#allocation18_spill] sm:$0xff] }
 0x1ab   : > { %v3593_v57 = vadd.f32 %v1195_v21, %v1073_v3  ;;  %1318 = vmatmul.f32.gmra.mxu1 %v3972_v28  ;;  %1480 = vmatmul.f32.gmra.mxu2 %v2299_v52  ;;  %v2301_v3 = vld [vmem:[%s2388_s14 + $0xa8] sm:$0xff] }
 0x1ad   : > { %1652 = vmatmul.f32.gmra.mxu3 %v3977_v6 }
 0x1ae   : > { %v864_v62 = vpop.f32.mrf.mxu2  ;;  %v1198_v17 = vpop.f32.mrf.mxu0 }
 0x1af   : > { %v912_v19 = vadd.f32 %v864_v62, %v622_v7 }
 0x1b0   : > { %v624_v29 = vpop.f32.mrf.mxu1  ;;  %v1026_v53 = vpop.f32.mrf.mxu3 }
 0x1b1   : > { %v1074_v39 = vadd.f32 %v1026_v53, %v912_v19  ;;  %1821 = vmatmul.f32.gmra.mxu0 %v3978_v22  ;;  %v625_v28 = vadd.f32 %v624_v29, %v3979_v43  ;;  %v3984_v53 = vld [vmem:[#allocation35_spill] sm:$0xff] }
 0x1b3   : > { %v3600_v41 = vadd.f32 %v1198_v17, %v1074_v39  ;;  %1321 = vmatmul.f32.gmra.mxu1 %v3975_v30  ;;  %1483 = vmatmul.f32.gmra.mxu2 %v2300_v20  ;;  %v3982_v30 = vld [vmem:[#allocation28_spill] sm:$0xff] }
 0x1b4   : > { %v2302_v20 = vld [vmem:[%s2388_s14 + $0xb0] sm:$0xff] }
 0x1b5   : > { %1655 = vmatmul.f32.gmra.mxu3 %v3980_v38 }
 0x1b6   : > { %v867_v61 = vpop.f32.mrf.mxu2  ;;  %v1201_v25 = vpop.f32.mrf.mxu0 }
 0x1b7   : > { %v913_v2 = vadd.f32 %v867_v61, %v625_v28  ;;  %v3986_v28 = vld [vmem:[#allocation22_spill] sm:$0xff] }
 0x1b8   : > { %v627_v33 = vpop.f32.mrf.mxu1  ;;  %v1029_v21 = vpop.f32.mrf.mxu3 }
 0x1b9   : > { %v1075_v63 = vadd.f32 %v1029_v21, %v913_v2  ;;  %1824 = vmatmul.f32.gmra.mxu0 %v3981_v18  ;;  %v628_v52 = vadd.f32 %v627_v33, %v3982_v30  ;;  %v3988_v30 = vld [vmem:[#allocation38_spill] sm:$0xff] }
 0x1bb   : > { %v3607_v27 = vadd.f32 %v1201_v25, %v1075_v63  ;;  %1324 = vmatmul.f32.gmra.mxu1 %v3978_v22  ;;  %1486 = vmatmul.f32.gmra.mxu2 %v2301_v3  ;;  %v3985_v22 = vld [vmem:[#allocation30_spill] sm:$0xff]  ;;  %v3987_v63 = vld [vmem:[#allocation37_spill] sm:$0xff] }
 0x1bd   : > { %1658 = vmatmul.f32.gmra.mxu3 %v3983_v16  ;;  %v3990_v16 = vld [vmem:[#allocation2_spill] sm:$0xff] }
 0x1be   : > { %v870_v7 = vpop.f32.mrf.mxu2  ;;  %v1204_v6 = vpop.f32.mrf.mxu0 }
 0x1bf   : > { %v914_v62 = vadd.f32 %v870_v7, %v628_v52 }
 0x1c0   : > { %v630_v17 = vpop.f32.mrf.mxu1  ;;  %v1032_v19 = vpop.f32.mrf.mxu3 }
 0x1c1   : > { %v1076_v29 = vadd.f32 %v1032_v19, %v914_v62  ;;  %1827 = vmatmul.f32.gmra.mxu0 %v3984_v53  ;;  %v631_v43 = vadd.f32 %v630_v17, %v3985_v22 }
 0x1c3   : > { %v3614_v39 = vadd.f32 %v1204_v6, %v1076_v29  ;;  %1327 = vmatmul.f32.gmra.mxu1 %v3981_v18  ;;  %1489 = vmatmul.f32.gmra.mxu2 %v2302_v20  ;;  %v3989_v18 = vld [vmem:[#allocation32_spill] sm:$0xff]  ;;  %v3991_v20 = vld [vmem:[#allocation41_spill] sm:$0xff] }
 0x1c5   : > { %1661 = vmatmul.f32.gmra.mxu3 %v3986_v28  ;;  %v3993_v28 = vld [vmem:[#allocation4_spill] sm:$0xff] }
 0x1c6   : > { %v873_v38 = vpop.f32.mrf.mxu2  ;;  %v1207_v61 = vpop.f32.mrf.mxu0 }
 0x1c7   : > { %v915_v25 = vadd.f32 %v873_v38, %v631_v43 }
 0x1c8   : > { %v633_v2 = vpop.f32.mrf.mxu1  ;;  %v1035_v33 = vpop.f32.mrf.mxu3 }
 0x1c9   : > { %v1077_v21 = vadd.f32 %v1035_v33, %v915_v25  ;;  %1830 = vmatmul.f32.gmra.mxu0 %v3987_v63  ;;  %v634_v52 = vadd.f32 %v633_v2, %v3989_v18 }
 0x1cb   : > { %v3621_v3 = vadd.f32 %v1207_v61, %v1077_v21  ;;  %1330 = vmatmul.f32.gmra.mxu1 %v3984_v53  ;;  %1492 = vmatmul.f32.gmra.mxu2 %v3988_v30  ;;  %v3992_v53 = vld [vmem:[#allocation34_spill] sm:$0xff] }
 0x1cd   : > { %1664 = vmatmul.f32.gmra.mxu3 %v3990_v16 }
 0x1ce   : > { %v876_v7 = vpop.f32.mrf.mxu2  ;;  %v1210_v6 = vpop.f32.mrf.mxu0 }
 0x1cf   : > { %v916_v62 = vadd.f32 %v876_v7, %v634_v52 }
 0x1d0   : > { %v636_v17 = vpop.f32.mrf.mxu1  ;;  %v1038_v19 = vpop.f32.mrf.mxu3 }
 0x1d1   : > { %v1078_v29 = vadd.f32 %v1038_v19, %v916_v62  ;;  %1833 = vmatmul.f32.gmra.mxu0 %v3991_v20  ;;  %v637_v43 = vadd.f32 %v636_v17, %v3992_v53 }
 0x1d3   : > { %v3628_v22 = vadd.f32 %v1210_v6, %v1078_v29  ;;  %1333 = vmatmul.f32.gmra.mxu1 %v3987_v63  ;;  %1495 = vmatmul.f32.gmra.mxu2 %v3229_v47  ;;  %v2303_v63 = vld [vmem:[%s2388_s14 + $0xd8] sm:$0xff]  ;;  %v3994_v47 = vld [vmem:[#allocation36_spill] sm:$0xff]  ;;  %v2304_v29 = vld [vmem:[%s2388_s14 + $0xe0] sm:$0xff] }
 0x1d5   : > { %1667 = vmatmul.f32.gmra.mxu3 %v3993_v28 }
 0x1d6   : > { %v879_v38 = vpop.f32.mrf.mxu2  ;;  %v1213_v61 = vpop.f32.mrf.mxu0 }
 0x1d7   : > { %v917_v25 = vadd.f32 %v879_v38, %v637_v43 }
 0x1d8   : > { %v639_v2 = vpop.f32.mrf.mxu1  ;;  %v1041_v33 = vpop.f32.mrf.mxu3 }
 0x1d9   : > { %v1079_v21 = vadd.f32 %v1041_v33, %v917_v25  ;;  %1836 = vmatmul.f32.gmra.mxu0 %v3261_v34  ;;  %v640_v18 = vadd.f32 %v639_v2, %v3994_v47  ;;  %v3996_v33 = vld [vmem:[#allocation42_spill] sm:$0xff] }
 0x1db   : > { %v3635_v30 = vadd.f32 %v1213_v61, %v1079_v21  ;;  %1336 = vmatmul.f32.gmra.mxu1 %v3991_v20  ;;  %1498 = vmatmul.f32.gmra.mxu2 %v2303_v63  ;;  %v3995_v20 = vld [vmem:[#allocation40_spill] sm:$0xff] }
 0x1dd   : > { %1670 = vmatmul.f32.gmra.mxu3 %v2576_v24 }
 0x1de   : > { %v882_v52 = vpop.f32.mrf.mxu2  ;;  %v1216_v16 = vpop.f32.mrf.mxu0 }
 0x1df   : > { %v918_v7 = vadd.f32 %v882_v52, %v640_v18 }
 0x1e0   : > { %v642_v6 = vpop.f32.mrf.mxu1  ;;  %v1044_v62 = vpop.f32.mrf.mxu3 }
 0x1e1   : > { %v1080_v17 = vadd.f32 %v1044_v62, %v918_v7  ;;  %1839 = vmatmul.f32.gmra.mxu0 %v3276_v50  ;;  %v643_v53 = vadd.f32 %v642_v6, %v3995_v20  ;;  %v3658_v7 = vld [vmem:[%s3829_s2] ss:$0 sm:$0xff]  ;;  %v2306_v6 = vld [vmem:[%s2388_s14 + $0xf8] sm:$0xff] }
 0x1e3   : > { %v3642_v19 = vadd.f32 %v1216_v16, %v1080_v17  ;;  %1339 = vmatmul.f32.gmra.mxu1 %v3261_v34  ;;  %1501 = vmatmul.f32.gmra.mxu2 %v2304_v29  ;;  %v2305_v34 = vld [vmem:[%s2388_s14 + $0xf0] sm:$0xff] }
 0x1e5   : > { %1673 = vmatmul.f32.gmra.mxu3 %v2645_v0 }
 0x1e6   : > { %v885_v24 = vpop.f32.mrf.mxu2  ;;  %v1219_v43 = vpop.f32.mrf.mxu0 }
 0x1e7   : > { %v919_v28 = vadd.f32 %v885_v24, %v643_v53 }
 0x1e8   : > { %v1047_v38 = vpop.f32.mrf.mxu3  ;;  %v1295_v61 = vpop.f32.mrf.mxu1 }
 0x1e9   : > { %v1081_v25 = vadd.f32 %v1047_v38, %v919_v28  ;;  %1842 = vmatmul.f32.gmra.mxu0 %v3296_v26  ;;  %v1391_v21 = vadd.f32 %v1295_v61, %v3996_v33 }
 0x1eb   : > { %v3649_v2 = vadd.f32 %v1219_v43, %v1081_v25  ;;  %1342 = vmatmul.f32.gmra.mxu1 %v3276_v50  ;;  %1504 = vmatmul.f32.gmra.mxu2 %v2305_v34 }
 0x1ed   : > { %1676 = vmatmul.f32.gmra.mxu3 %v2731_v48 }
 0x1ee   : > { %v1457_v0 = vpop.f32.mrf.mxu2  ;;  %v1798_v63 = vpop.f32.mrf.mxu0 }
 0x1ef   : > { %v1553_v47 = vadd.f32 %v1457_v0, %v1391_v21 }
 0x1f0   : > { %v1298_v18 = vpop.f32.mrf.mxu1  ;;  %v1629_v52 = vpop.f32.mrf.mxu3 }
 0x1f1   : > { %v1725_v16 = vadd.f32 %v1629_v52, %v1553_v47  ;;  %1845 = vmatmul.f32.gmra.mxu0 %v3311_v59  ;;  %v1392_v48 = vadd.f32 %v1298_v18, %v3279_v11  ;;  %v2308_v47 = vld [vmem:[%s2388_s14 + $0x110] sm:$0xff]  ;;  %v3997_v18 = vld [vmem:[#allocation23_spill] sm:$0xff] }
 0x1f3   : > { %v1894_v50 = vadd.f32 %v1798_v63, %v1725_v16  ;;  %1345 = vmatmul.f32.gmra.mxu1 %v3296_v26  ;;  %1507 = vmatmul.f32.gmra.mxu2 %v2306_v6 }
 0x1f5   : > { %v1930_v62 = vadd.f32 %v3658_v7, %v1894_v50  ;;  %1679 = vmatmul.f32.gmra.mxu3 %v2805_v9  ;;  %v2307_v9 = vld [vmem:[%s2388_s14 + $0x108] sm:$0xff] }
 0x1f6   : > { %v1460_v17 = vpop.f32.mrf.mxu2  ;;  %v1801_v29 = vpop.f32.mrf.mxu0 }
 0x1f7   : > { %v1962_v20 = vmax.f32 %v1930_v62, 0.0  ;;  %v1554_v53 = vadd.f32 %v1460_v17, %v1392_v48 }
 0x1f8   : > { %v1301_v26 = vpop.f32.mrf.mxu1  ;;  %v1632_v24 = vpop.f32.mrf.mxu3 }
 0x1f9   : > { %1994 = vst [vmem:[%s3670_s22] sm:$0xff] %v1962_v20  ;;  %v1726_v43 = vadd.f32 %v1632_v24, %v1554_v53  ;;  %1848 = vmatmul.f32.gmra.mxu0 %v3331_v51  ;;  %v1393_v28 = vadd.f32 %v1301_v26, %v3299_v15  ;;  %v3999_v53 = vld [vmem:[#allocation3_spill] sm:$0xff] }
 0x1fb   : > { %v1895_v11 = vadd.f32 %v1801_v29, %v1726_v43  ;;  %1348 = vmatmul.f32.gmra.mxu1 %v3311_v59  ;;  %1510 = vmatmul.f32.gmra.mxu2 %v2307_v9 }
 0x1fd   : > { %v1931_v38 = vadd.f32 %v3658_v7, %v1895_v11  ;;  %1682 = vmatmul.f32.gmra.mxu3 %v3939_v23 }
 0x1fe   : > { %v1463_v61 = vpop.f32.mrf.mxu2  ;;  %v1804_v25 = vpop.f32.mrf.mxu0 }
 0x1ff   : > { %v1963_v34 = vmax.f32 %v1931_v38, 0.0  ;;  %v1555_v33 = vadd.f32 %v1463_v61, %v1393_v28  ;;  %v4000_v61 = vld [vmem:[#allocation20_spill] sm:$0xff] }
 0x200   : > { %v1304_v21 = vpop.f32.mrf.mxu1  ;;  %v1635_v0 = vpop.f32.mrf.mxu3 }
 0x201   : > { %1995 = vst [vmem:[%s3670_s22 + $0x8] sm:$0xff] %v1963_v34  ;;  %v1727_v63 = vadd.f32 %v1635_v0, %v1555_v33  ;;  %1851 = vmatmul.f32.gmra.mxu0 %v3346_v60  ;;  %v1394_v15 = vadd.f32 %v1304_v21, %v3314_v55  ;;  %v3998_v55 = vld [vmem:[#allocation13_spill] sm:$0xff] }
 0x202   : > { %v4002_v33 = vld [vmem:[#allocation5_spill] sm:$0xff] }
 0x203   : > { %v1896_v59 = vadd.f32 %v1804_v25, %v1727_v63  ;;  %1351 = vmatmul.f32.gmra.mxu1 %v3331_v51  ;;  %1513 = vmatmul.f32.gmra.mxu2 %v2308_v47 }
 0x205   : > { %v1932_v23 = vadd.f32 %v3658_v7, %v1896_v59  ;;  %1685 = vmatmul.f32.gmra.mxu3 %v3997_v18  ;;  %v4003_v18 = vld [vmem:[#allocation45_spill] sm:$0xff] }
 0x206   : > { %v1466_v52 = vpop.f32.mrf.mxu2  ;;  %v1807_v16 = vpop.f32.mrf.mxu0 }
 0x207   : > { %v1964_v50 = vmax.f32 %v1932_v23, 0.0  ;;  %v1556_v6 = vadd.f32 %v1466_v52, %v1394_v15  ;;  %v4005_v52 = vld [vmem:[#allocation14_spill] sm:$0xff] }
 0x208   : > { %v1307_v48 = vpop.f32.mrf.mxu1  ;;  %v1638_v62 = vpop.f32.mrf.mxu3 }
 0x209   : > { %1996 = vst [vmem:[%s3670_s22 + $0x10] sm:$0xff] %v1964_v50  ;;  %v1728_v17 = vadd.f32 %v1638_v62, %v1556_v6  ;;  %1854 = vmatmul.f32.gmra.mxu0 %v3369_v10  ;;  %v1395_v29 = vadd.f32 %v1307_v48, %v3998_v55  ;;  %v4006_v6 = vld [vmem:[#allocation7_spill] sm:$0xff] }
 0x20b   : > { %v1897_v51 = vadd.f32 %v1807_v16, %v1728_v17  ;;  %1354 = vmatmul.f32.gmra.mxu1 %v3346_v60  ;;  %1516 = vmatmul.f32.gmra.mxu2 %v3359_v45  ;;  %v4001_v45 = vld [vmem:[#allocation19_spill] sm:$0xff] }
 0x20d   : > { %v1933_v20 = vadd.f32 %v3658_v7, %v1897_v51  ;;  %1688 = vmatmul.f32.gmra.mxu3 %v3999_v53  ;;  %v4007_v53 = vld [vmem:[#allocation48_spill] sm:$0xff] }
 0x20e   : > { %v1469_v26 = vpop.f32.mrf.mxu2  ;;  %v1810_v24 = vpop.f32.mrf.mxu0 }
 0x20f   : > { %v1965_v43 = vmax.f32 %v1933_v20, 0.0  ;;  %v1557_v11 = vadd.f32 %v1469_v26, %v1395_v29 }
 0x210   : > { %v1310_v9 = vpop.f32.mrf.mxu1  ;;  %v1641_v28 = vpop.f32.mrf.mxu3 }
 0x211   : > { %1997 = vst [vmem:[%s3670_s22 + $0x18] sm:$0xff] %v1965_v43  ;;  %v1729_v38 = vadd.f32 %v1641_v28, %v1557_v11  ;;  %1857 = vmatmul.f32.gmra.mxu0 %v4000_v61  ;;  %v1396_v25 = vadd.f32 %v1310_v9, %v4001_v45  ;;  %v4009_v43 = vld [vmem:[#allocation43_spill] sm:$0xff]  ;;  %v4010_v28 = vld [vmem:[#allocation9_spill] sm:$0xff] }
 0x213   : > { %v1898_v60 = vadd.f32 %v1810_v24, %v1729_v38  ;;  %1357 = vmatmul.f32.gmra.mxu1 %v3369_v10  ;;  %1519 = vmatmul.f32.gmra.mxu2 %v3378_v40  ;;  %v4004_v40 = vld [vmem:[#allocation44_spill] sm:$0xff]  ;;  %v4008_v24 = vld [vmem:[#allocation47_spill] sm:$0xff] }
 0x215   : > { %v1934_v34 = vadd.f32 %v3658_v7, %v1898_v60  ;;  %1691 = vmatmul.f32.gmra.mxu3 %v4002_v33 }
 0x216   : > { %v1472_v21 = vpop.f32.mrf.mxu2  ;;  %v1813_v0 = vpop.f32.mrf.mxu0 }
 0x217   : > { %v1966_v63 = vmax.f32 %v1934_v34, 0.0  ;;  %v1558_v59 = vadd.f32 %v1472_v21, %v1396_v25  ;;  %v4011_v21 = vld [vmem:[#allocation50_spill] sm:$0xff] }
 0x218   : > { %v1313_v47 = vpop.f32.mrf.mxu1  ;;  %v1644_v15 = vpop.f32.mrf.mxu3 }
 0x219   : > { %1998 = vst [vmem:[%s3670_s22 + $0x20] sm:$0xff] %v1966_v63  ;;  %v1730_v23 = vadd.f32 %v1644_v15, %v1558_v59  ;;  %1860 = vmatmul.f32.gmra.mxu0 %v4003_v18  ;;  %v1397_v16 = vadd.f32 %v1313_v47, %v4005_v52  ;;  %v4012_v63 = vld [vmem:[#allocation46_spill] sm:$0xff]  ;;  %v4013_v15 = vld [vmem:[#allocation11_spill] sm:$0xff] }
 0x21b   : > { %v1899_v10 = vadd.f32 %v1813_v0, %v1730_v23  ;;  %1360 = vmatmul.f32.gmra.mxu1 %v4000_v61  ;;  %1522 = vmatmul.f32.gmra.mxu2 %v4004_v40 }
 0x21d   : > { %v1935_v50 = vadd.f32 %v3658_v7, %v1899_v10  ;;  %1694 = vmatmul.f32.gmra.mxu3 %v4006_v6 }
 0x21e   : > { %v1475_v48 = vpop.f32.mrf.mxu2  ;;  %v1816_v62 = vpop.f32.mrf.mxu0 }
 0x21f   : > { %v1967_v17 = vmax.f32 %v1935_v50, 0.0  ;;  %v1559_v51 = vadd.f32 %v1475_v48, %v1397_v16 }
 0x220   : > { %v1316_v55 = vpop.f32.mrf.mxu1  ;;  %v1647_v29 = vpop.f32.mrf.mxu3 }
 0x221   : > { %1999 = vst [vmem:[%s3670_s22 + $0x28] sm:$0xff] %v1967_v17  ;;  %v1731_v20 = vadd.f32 %v1647_v29, %v1559_v51  ;;  %1863 = vmatmul.f32.gmra.mxu0 %v4007_v53  ;;  %v1398_v11 = vadd.f32 %v1316_v55, %v4009_v43 }
 0x223   : > { %v1900_v26 = vadd.f32 %v1816_v62, %v1731_v20  ;;  %1363 = vmatmul.f32.gmra.mxu1 %v4003_v18  ;;  %1525 = vmatmul.f32.gmra.mxu2 %v4008_v24  ;;  %v4015_v24 = vld [vmem:[#allocation16_spill] sm:$0xff] }
 0x225   : > { %v1936_v9 = vadd.f32 %v3658_v7, %v1900_v26  ;;  %1697 = vmatmul.f32.gmra.mxu3 %v4010_v28 }
 0x226   : > { %v1478_v38 = vpop.f32.mrf.mxu2  ;;  %v1819_v61 = vpop.f32.mrf.mxu0 }
 0x227   : > { %v1968_v60 = vmax.f32 %v1936_v9, 0.0  ;;  %v1560_v45 = vadd.f32 %v1478_v38, %v1398_v11  ;;  %v4017_v9 = vld [vmem:[#allocation21_spill] sm:$0xff] }
 0x228   : > { %v1319_v25 = vpop.f32.mrf.mxu1  ;;  %v1650_v34 = vpop.f32.mrf.mxu3 }
 0x229   : > { %2000 = vst [vmem:[%s3670_s22 + $0x30] sm:$0xff] %v1968_v60  ;;  %v1732_v33 = vadd.f32 %v1650_v34, %v1560_v45  ;;  %1866 = vmatmul.f32.gmra.mxu0 %v4011_v21  ;;  %v1399_v59 = vadd.f32 %v1319_v25, %v4012_v63  ;;  %v4020_v63 = vld [vmem:[#allocation24_spill] sm:$0xff] }
 0x22b   : > { %v1901_v0 = vadd.f32 %v1819_v61, %v1732_v33  ;;  %1366 = vmatmul.f32.gmra.mxu1 %v4007_v53  ;;  %1528 = vmatmul.f32.gmra.mxu2 %v3441_v12  ;;  %v4014_v12 = vld [vmem:[#allocation49_spill] sm:$0xff] }
 0x22c   : > { %v4018_v33 = vld [vmem:[#allocation17_spill] sm:$0xff] }
 0x22d   : > { %v1937_v47 = vadd.f32 %v3658_v7, %v1901_v0  ;;  %1700 = vmatmul.f32.gmra.mxu3 %v4013_v15 }
 0x22e   : > { %v1481_v23 = vpop.f32.mrf.mxu2  ;;  %v1822_v18 = vpop.f32.mrf.mxu0 }
 0x22f   : > { %v1969_v10 = vmax.f32 %v1937_v47, 0.0  ;;  %v1561_v40 = vadd.f32 %v1481_v23, %v1399_v59 }
 0x230   : > { %v1322_v52 = vpop.f32.mrf.mxu1  ;;  %v1653_v16 = vpop.f32.mrf.mxu3 }
 0x231   : > { %2001 = vst [vmem:[%s3670_s22 + $0x38] sm:$0xff] %v1969_v10  ;;  %v1733_v50 = vadd.f32 %v1653_v16, %v1561_v40  ;;  %1869 = vmatmul.f32.gmra.mxu0 %v3469_v36  ;;  %v1400_v48 = vadd.f32 %v1322_v52, %v4014_v12  ;;  %v1271_v52 = vrot.slane %v3501_v4, 2 }
 0x233   : > { %v1902_v6 = vadd.f32 %v1822_v18, %v1733_v50  ;;  %1369 = vmatmul.f32.gmra.mxu1 %v4011_v21  ;;  %1531 = vmatmul.f32.gmra.mxu2 %v3460_v35  ;;  %v4016_v35 = vld [vmem:[#allocation51_spill] sm:$0xff]  ;;  %v4021_v50 = vld [vmem:[#allocation52_spill] sm:$0xff] }
 0x235   : > { %v1938_v62 = vadd.f32 %v3658_v7, %v1902_v6  ;;  %1703 = vmatmul.f32.gmra.mxu3 %v3960_v42 }
 0x236   : > { %v1484_v17 = vpop.f32.mrf.mxu2  ;;  %v1825_v51 = vpop.f32.mrf.mxu0 }
 0x237   : > { %v1970_v55 = vmax.f32 %v1938_v62, 0.0  ;;  %v1562_v29 = vadd.f32 %v1484_v17, %v1400_v48 }
 0x238   : > { %v1325_v20 = vpop.f32.mrf.mxu1  ;;  %v1656_v53 = vpop.f32.mrf.mxu3 }
 0x239   : > { %2002 = vst [vmem:[%s3670_s22 + $0x40] sm:$0xff] %v1970_v55  ;;  %v1734_v26 = vadd.f32 %v1656_v53, %v1562_v29  ;;  %1872 = vmatmul.f32.gmra.mxu0 %v4015_v24  ;;  %v1401_v11 = vadd.f32 %v1325_v20, %v4016_v35  ;;  %v4023_v35 = vld [vmem:[#allocation53_spill] sm:$0xff] }
 0x23b   : > { %v1903_v43 = vadd.f32 %v1825_v51, %v1734_v26  ;;  %1372 = vmatmul.f32.gmra.mxu1 %v3469_v36  ;;  %1534 = vmatmul.f32.gmra.mxu2 %v3488_v37  ;;  %v4019_v37 = vld [vmem:[#allocation15_spill] sm:$0xff] }
 0x23d   : > { %v1939_v42 = vadd.f32 %v3658_v7, %v1903_v43  ;;  %1706 = vmatmul.f32.gmra.mxu3 %v4017_v9  ;;  %v223_v43 = vld [vmem:[%s2388_s14 + $0x1a0] sm:$0xff] }
 0x23e   : > { %v1487_v28 = vpop.f32.mrf.mxu2  ;;  %v1828_v38 = vpop.f32.mrf.mxu0 }
 0x23f   : > { %v1971_v61 = vmax.f32 %v1939_v42, 0.0  ;;  %v1563_v60 = vadd.f32 %v1487_v28, %v1401_v11 }
 0x240   : > { %v1328_v45 = vpop.f32.mrf.mxu1  ;;  %v1659_v25 = vpop.f32.mrf.mxu3 }
 0x241   : > { %2003 = vst [vmem:[%s3670_s22 + $0x48] sm:$0xff] %v1971_v61  ;;  %v1735_v34 = vadd.f32 %v1659_v25, %v1563_v60  ;;  %1875 = vmatmul.f32.gmra.mxu0 %v4018_v33  ;;  %v1402_v21 = vadd.f32 %v1328_v45, %v4019_v37  ;;  %v1606_v61 = vrot.slane %v223_v43, 1  ;;  %v1775_v37 = vrot.slane %v223_v43, 2 }
 0x243   : > { %v1904_v36 = vadd.f32 %v1828_v38, %v1735_v34  ;;  %1375 = vmatmul.f32.gmra.mxu1 %v4015_v24  ;;  %1537 = vmatmul.f32.gmra.mxu2 %v3527_v14  ;;  %v1272_v14 = vrot.slane %v3495_v54, 2 }
 0x245   : > { %v1940_v0 = vadd.f32 %v3658_v7, %v1904_v36  ;;  %1709 = vmatmul.f32.gmra.mxu3 %v4020_v63  ;;  %v1273_v17 = vsel %vm662_vm1, %v1271_v52, %v1272_v14 }
 0x246   : > { %v1490_v59 = vpop.f32.mrf.mxu2  ;;  %v1831_v47 = vpop.f32.mrf.mxu0 }
 0x247   : > { %v1972_v15 = vmax.f32 %v1940_v0, 0.0  ;;  %v1564_v23 = vadd.f32 %v1490_v59, %v1402_v21  ;;  %v224_v21 = vld [vmem:[%s2388_s14 + $0x1a8] sm:$0x3] }
 0x248   : > { %v1331_v18 = vpop.f32.mrf.mxu1  ;;  %v1662_v10 = vpop.f32.mrf.mxu3  ;;  %v4024_v0 = vld [vmem:[#allocation55_spill] sm:$0xff] }
 0x249   : > { %2004 = vst [vmem:[%s3670_s22 + $0x50] sm:$0xff] %v1972_v15  ;;  %v1736_v40 = vadd.f32 %v1662_v10, %v1564_v23  ;;  %1878 = vmatmul.f32.gmra.mxu0 %v3520_v44  ;;  %v1403_v6 = vadd.f32 %v1331_v18, %v4021_v50  ;;  %v1608_v23 = vrot.slane %v224_v21, 1 }
 0x24b   : > { %v1905_v16 = vadd.f32 %v1831_v47, %v1736_v40  ;;  %1378 = vmatmul.f32.gmra.mxu1 %v4018_v33  ;;  %1540 = vmatmul.f32.gmra.mxu2 %v3501_v4  ;;  %v4022_v4 = vld [vmem:[#allocation54_spill] sm:$0xff]  ;;  %v1609_v50 = vsel %vm306_vm0, %v1606_v61, %v1608_v23 }
 0x24c   : > { %v1274_v26 = vrot.slane %v4022_v4, 2 }
 0x24d   : > { %v1941_v12 = vadd.f32 %v3658_v7, %v1905_v16  ;;  %1712 = vmatmul.f32.gmra.mxu3 %v3514_v5  ;;  %v222_v5 = vld [vmem:[%s2388_s14 + $0x198] sm:$0xff] }
 0x24e   : > { %v1493_v48 = vpop.f32.mrf.mxu2  ;;  %v1834_v62 = vpop.f32.mrf.mxu0  ;;  %v1605_v38 = vrot.slane %v222_v5, 1  ;;  %v1275_v60 = vsel %vm662_vm1, %v1272_v14, %v1274_v26  ;;  %v1774_v33 = vrot.slane %v222_v5, 2 }
 0x24f   : > { %v1973_v51 = vmax.f32 %v1941_v12, 0.0  ;;  %v1565_v55 = vadd.f32 %v1493_v48, %v1403_v6  ;;  %v1777_v6 = vrot.slane %v224_v21, 2 }
 0x250   : > { %v1334_v29 = vpop.f32.mrf.mxu1  ;;  %v1665_v20 = vpop.f32.mrf.mxu3  ;;  %v1607_v36 = vsel %vm306_vm0, %v1605_v38, %v1606_v61  ;;  %v1776_v18 = vsel %vm662_vm1, %v1774_v33, %v1775_v37 }
 0x251   : > { %2005 = vst [vmem:[%s3670_s22 + $0x58] sm:$0xff] %v1973_v51  ;;  %v1737_v53 = vadd.f32 %v1665_v20, %v1565_v55  ;;  %1881 = vmatmul.f32.gmra.mxu0 %v1273_v17  ;;  %v1404_v11 = vadd.f32 %v1334_v29, %v4023_v35  ;;  %v1778_v55 = vsel %vm662_vm1, %v1775_v37, %v1777_v6 }
 0x253   : > { %v1906_v24 = vadd.f32 %v1834_v62, %v1737_v53  ;;  %1381 = vmatmul.f32.gmra.mxu1 %v3520_v44  ;;  %1543 = vmatmul.f32.gmra.mxu2 %v3495_v54 }
 0x255   : > { %v1942_v42 = vadd.f32 %v3658_v7, %v1906_v24  ;;  %1715 = vmatmul.f32.gmra.mxu3 %v3534_v8 }
 0x256   : > { %v1496_v9 = vpop.f32.mrf.mxu2  ;;  %v1837_v28 = vpop.f32.mrf.mxu0 }
 0x257   : > { %v1974_v45 = vmax.f32 %v1942_v42, 0.0  ;;  %v1566_v44 = vadd.f32 %v1496_v9, %v1404_v11 }
 0x258   : > { %v1337_v25 = vpop.f32.mrf.mxu1  ;;  %v1668_v34 = vpop.f32.mrf.mxu3 }
 0x259   : > { %2006 = vst [vmem:[%s3670_s22 + $0x60] sm:$0xff] %v1974_v45  ;;  %v1738_v54 = vadd.f32 %v1668_v34, %v1566_v44  ;;  %1884 = vmatmul.f32.gmra.mxu0 %v1275_v60  ;;  %v1405_v63 = vadd.f32 %v1337_v25, %v4024_v0 }
 0x25b   : > { %v1907_v8 = vadd.f32 %v1837_v28, %v1738_v54  ;;  %1384 = vmatmul.f32.gmra.mxu1 %v1273_v17  ;;  %1546 = vmatmul.f32.gmra.mxu2 %v222_v5 }
 0x25d   : > { %v1943_v59 = vadd.f32 %v3658_v7, %v1907_v8  ;;  %1718 = vmatmul.f32.gmra.mxu3 %v1607_v36 }
 0x25e   : > { %v1499_v47 = vpop.f32.mrf.mxu2  ;;  %v1840_v15 = vpop.f32.mrf.mxu0 }
 0x25f   : > { %v1975_v10 = vmax.f32 %v1943_v59, 0.0  ;;  %v1567_v40 = vadd.f32 %v1499_v47, %v1405_v63 }
 0x260   : > { %v1340_v52 = vpop.f32.mrf.mxu1  ;;  %v1671_v14 = vpop.f32.mrf.mxu3 }
 0x261   : > { %2007 = vst [vmem:[%s3670_s22 + $0x68] sm:$0xff] %v1975_v10  ;;  %v1739_v16 = vadd.f32 %v1671_v14, %v1567_v40  ;;  %1887 = vmatmul.f32.gmra.mxu0 %v1776_v18  ;;  %v1406_v48 = vadd.f32 %v1340_v52, %v3537_v31 }
 0x263   : > { %v1908_v12 = vadd.f32 %v1840_v15, %v1739_v16  ;;  %1387 = vmatmul.f32.gmra.mxu1 %v1275_v60  ;;  %1549 = vmatmul.f32.gmra.mxu2 %v223_v43 }
 0x265   : > { %v1944_v62 = vadd.f32 %v3658_v7, %v1908_v12  ;;  %1721 = vmatmul.f32.gmra.mxu3 %v1609_v50 }
 0x266   : > { %v1502_v17 = vpop.f32.mrf.mxu2  ;;  %v1843_v51 = vpop.f32.mrf.mxu0 }
 0x267   : > { %v1976_v29 = vmax.f32 %v1944_v62, 0.0  ;;  %v1568_v20 = vadd.f32 %v1502_v17, %v1406_v48 }
 0x268   : > { %v1343_v53 = vpop.f32.mrf.mxu1  ;;  %v1674_v4 = vpop.f32.mrf.mxu3 }
 0x269   : > { %2008 = vst [vmem:[%s3670_s22 + $0x70] sm:$0xff] %v1976_v29  ;;  %v1740_v26 = vadd.f32 %v1674_v4, %v1568_v20  ;;  %1890 = vmatmul.f32.gmra.mxu0 %v1778_v55  ;;  %v1407_v5 = vadd.f32 %v1343_v53, %v3544_v13 }
 0x26b   : > { %v1909_v24 = vadd.f32 %v1843_v51, %v1740_v26 }
 0x26d   : > { %v1945_v31 = vadd.f32 %v3658_v7, %v1909_v24 }
 0x26e   : > { %v1505_v43 = vpop.f32.mrf.mxu2  ;;  %v1846_v35 = vpop.f32.mrf.mxu0 }
 0x26f   : > { %v1977_v11 = vmax.f32 %v1945_v31, 0.0  ;;  %v1569_v42 = vadd.f32 %v1505_v43, %v1407_v5 }
 0x270   : > { %v1346_v9 = vpop.f32.mrf.mxu1  ;;  %v1677_v28 = vpop.f32.mrf.mxu3 }
 0x271   : > { %2009 = vst [vmem:[%s3670_s22 + $0x78] sm:$0xff] %v1977_v11  ;;  %v1741_v38 = vadd.f32 %v1677_v28, %v1569_v42  ;;  %v1408_v60 = vadd.f32 %v1346_v9, %v3551_v1 }
 0x273   : > { %v1910_v61 = vadd.f32 %v1846_v35, %v1741_v38 }
 0x275   : > { %v1946_v45 = vadd.f32 %v3658_v7, %v1910_v61 }
 0x276   : > { %v1508_v44 = vpop.f32.mrf.mxu2  ;;  %v1849_v25 = vpop.f32.mrf.mxu0 }
 0x277   : > { %v1978_v13 = vmax.f32 %v1946_v45, 0.0  ;;  %v1570_v34 = vadd.f32 %v1508_v44, %v1408_v60 }
 0x278   : > { %v1349_v54 = vpop.f32.mrf.mxu1  ;;  %v1680_v33 = vpop.f32.mrf.mxu3 }
 0x279   : > { %2010 = vst [vmem:[%s3670_s22 + $0x80] sm:$0xff] %v1978_v13  ;;  %v1742_v36 = vadd.f32 %v1680_v33, %v1570_v34  ;;  %v1409_v8 = vadd.f32 %v1349_v54, %v3558_v46 }
 0x27b   : > { %v1911_v37 = vadd.f32 %v1849_v25, %v1742_v36 }
 0x27d   : > { %v1947_v21 = vadd.f32 %v3658_v7, %v1911_v37 }
 0x27e   : > { %v1511_v0 = vpop.f32.mrf.mxu2  ;;  %v1852_v63 = vpop.f32.mrf.mxu0 }
 0x27f   : > { %v1979_v1 = vmax.f32 %v1947_v21, 0.0  ;;  %v1571_v59 = vadd.f32 %v1511_v0, %v1409_v8 }
 0x280   : > { %v1352_v47 = vpop.f32.mrf.mxu1  ;;  %v1683_v15 = vpop.f32.mrf.mxu3 }
 0x281   : > { %2011 = vst [vmem:[%s3670_s22 + $0x88] sm:$0xff] %v1979_v1  ;;  %v1743_v23 = vadd.f32 %v1683_v15, %v1571_v59  ;;  %v1410_v10 = vadd.f32 %v1352_v47, %v3565_v56 }
 0x283   : > { %v1912_v18 = vadd.f32 %v1852_v63, %v1743_v23 }
 0x285   : > { %v1948_v40 = vadd.f32 %v3658_v7, %v1912_v18 }
 0x286   : > { %v1514_v52 = vpop.f32.mrf.mxu2  ;;  %v1855_v14 = vpop.f32.mrf.mxu0 }
 0x287   : > { %v1980_v46 = vmax.f32 %v1948_v40, 0.0  ;;  %v1572_v16 = vadd.f32 %v1514_v52, %v1410_v10 }
 0x288   : > { %v1355_v50 = vpop.f32.mrf.mxu1  ;;  %v1686_v6 = vpop.f32.mrf.mxu3 }
 0x289   : > { %2012 = vst [vmem:[%s3670_s22 + $0x90] sm:$0xff] %v1980_v46  ;;  %v1744_v12 = vadd.f32 %v1686_v6, %v1572_v16  ;;  %v1411_v62 = vadd.f32 %v1355_v50, %v3572_v49 }
 0x28b   : > { %v1913_v48 = vadd.f32 %v1855_v14, %v1744_v12 }
 0x28d   : > { %v1949_v17 = vadd.f32 %v3658_v7, %v1913_v48 }
 0x28e   : > { %v1517_v51 = vpop.f32.mrf.mxu2  ;;  %v1858_v55 = vpop.f32.mrf.mxu0 }
 0x28f   : > { %v1981_v56 = vmax.f32 %v1949_v17, 0.0  ;;  %v1573_v29 = vadd.f32 %v1517_v51, %v1411_v62 }
 0x290   : > { %v1358_v20 = vpop.f32.mrf.mxu1  ;;  %v1689_v53 = vpop.f32.mrf.mxu3 }
 0x291   : > { %2013 = vst [vmem:[%s3670_s22 + $0x98] sm:$0xff] %v1981_v56  ;;  %v1745_v4 = vadd.f32 %v1689_v53, %v1573_v29  ;;  %v1412_v24 = vadd.f32 %v1358_v20, %v3579_v32 }
 0x293   : > { %v1914_v26 = vadd.f32 %v1858_v55, %v1745_v4 }
 0x295   : > { %v1950_v5 = vadd.f32 %v3658_v7, %v1914_v26 }
 0x296   : > { %v1520_v31 = vpop.f32.mrf.mxu2  ;;  %v1861_v43 = vpop.f32.mrf.mxu0 }
 0x297   : > { %v1982_v49 = vmax.f32 %v1950_v5, 0.0  ;;  %v1574_v35 = vadd.f32 %v1520_v31, %v1412_v24 }
 0x298   : > { %v1361_v11 = vpop.f32.mrf.mxu1  ;;  %v1692_v42 = vpop.f32.mrf.mxu3 }
 0x299   : > { %2014 = vst [vmem:[%s3670_s22 + $0xa0] sm:$0xff] %v1982_v49  ;;  %v1746_v9 = vadd.f32 %v1692_v42, %v1574_v35  ;;  %v1413_v38 = vadd.f32 %v1361_v11, %v3586_v58 }
 0x29b   : > { %v1915_v28 = vadd.f32 %v1861_v43, %v1746_v9 }
 0x29d   : > { %v1951_v61 = vadd.f32 %v3658_v7, %v1915_v28 }
 0x29e   : > { %v1523_v60 = vpop.f32.mrf.mxu2  ;;  %v1864_v45 = vpop.f32.mrf.mxu0 }
 0x29f   : > { %v1983_v32 = vmax.f32 %v1951_v61, 0.0  ;;  %v1575_v44 = vadd.f32 %v1523_v60, %v1413_v38 }
 0x2a0   : > { %v1364_v25 = vpop.f32.mrf.mxu1  ;;  %v1695_v13 = vpop.f32.mrf.mxu3 }
 0x2a1   : > { %2015 = vst [vmem:[%s3670_s22 + $0xa8] sm:$0xff] %v1983_v32  ;;  %v1747_v34 = vadd.f32 %v1695_v13, %v1575_v44  ;;  %v1414_v33 = vadd.f32 %v1364_v25, %v3593_v57 }
 0x2a3   : > { %v1916_v54 = vadd.f32 %v1864_v45, %v1747_v34 }
 0x2a5   : > { %v1952_v36 = vadd.f32 %v3658_v7, %v1916_v54 }
 0x2a6   : > { %v1526_v37 = vpop.f32.mrf.mxu2  ;;  %v1867_v8 = vpop.f32.mrf.mxu0 }
 0x2a7   : > { %v1984_v58 = vmax.f32 %v1952_v36, 0.0  ;;  %v1576_v21 = vadd.f32 %v1526_v37, %v1414_v33 }
 0x2a8   : > { %v1367_v0 = vpop.f32.mrf.mxu1  ;;  %v1698_v63 = vpop.f32.mrf.mxu3 }
 0x2a9   : > { %2016 = vst [vmem:[%s3670_s22 + $0xb0] sm:$0xff] %v1984_v58  ;;  %v1748_v1 = vadd.f32 %v1698_v63, %v1576_v21  ;;  %v1415_v47 = vadd.f32 %v1367_v0, %v3600_v41 }
 0x2ab   : > { %v1917_v59 = vadd.f32 %v1867_v8, %v1748_v1 }
 0x2ad   : > { %v1953_v15 = vadd.f32 %v3658_v7, %v1917_v59 }
 0x2ae   : > { %v1529_v23 = vpop.f32.mrf.mxu2  ;;  %v1870_v18 = vpop.f32.mrf.mxu0 }
 0x2af   : > { %v1985_v57 = vmax.f32 %v1953_v15, 0.0  ;;  %v1577_v10 = vadd.f32 %v1529_v23, %v1415_v47 }
 0x2b0   : > { %v1370_v40 = vpop.f32.mrf.mxu1  ;;  %v1701_v52 = vpop.f32.mrf.mxu3 }
 0x2b1   : > { %2017 = vst [vmem:[%s3670_s22 + $0xb8] sm:$0xff] %v1985_v57  ;;  %v1749_v14 = vadd.f32 %v1701_v52, %v1577_v10  ;;  %v1416_v16 = vadd.f32 %v1370_v40, %v3607_v27 }
 0x2b3   : > { %v1918_v46 = vadd.f32 %v1870_v18, %v1749_v14 }
 0x2b5   : > { %v1954_v50 = vadd.f32 %v3658_v7, %v1918_v46 }
 0x2b6   : > { %v1532_v6 = vpop.f32.mrf.mxu2  ;;  %v1873_v12 = vpop.f32.mrf.mxu0 }
 0x2b7   : > { %v1986_v41 = vmax.f32 %v1954_v50, 0.0  ;;  %v1578_v48 = vadd.f32 %v1532_v6, %v1416_v16 }
 0x2b8   : > { %v1373_v62 = vpop.f32.mrf.mxu1  ;;  %v1704_v17 = vpop.f32.mrf.mxu3 }
 0x2b9   : > { %2018 = vst [vmem:[%s3670_s22 + $0xc0] sm:$0xff] %v1986_v41  ;;  %v1750_v51 = vadd.f32 %v1704_v17, %v1578_v48  ;;  %v1417_v56 = vadd.f32 %v1373_v62, %v3614_v39 }
 0x2bb   : > { %v1919_v55 = vadd.f32 %v1873_v12, %v1750_v51 }
 0x2bd   : > { %v1955_v29 = vadd.f32 %v3658_v7, %v1919_v55 }
 0x2be   : > { %v1535_v20 = vpop.f32.mrf.mxu2  ;;  %v1876_v53 = vpop.f32.mrf.mxu0 }
 0x2bf   : > { %v1987_v27 = vmax.f32 %v1955_v29, 0.0  ;;  %v1579_v4 = vadd.f32 %v1535_v20, %v1417_v56 }
 0x2c0   : > { %v1376_v26 = vpop.f32.mrf.mxu1  ;;  %v1707_v24 = vpop.f32.mrf.mxu3 }
 0x2c1   : > { %2019 = vst [vmem:[%s3670_s22 + $0xc8] sm:$0xff] %v1987_v27  ;;  %v1751_v5 = vadd.f32 %v1707_v24, %v1579_v4  ;;  %v1418_v43 = vadd.f32 %v1376_v26, %v3621_v3 }
 0x2c3   : > { %v1920_v31 = vadd.f32 %v1876_v53, %v1751_v5 }
 0x2c5   : > { %v1956_v49 = vadd.f32 %v3658_v7, %v1920_v31 }
 0x2c6   : > { %v1538_v35 = vpop.f32.mrf.mxu2  ;;  %v1879_v11 = vpop.f32.mrf.mxu0 }
 0x2c7   : > { %v1988_v39 = vmax.f32 %v1956_v49, 0.0  ;;  %v1580_v42 = vadd.f32 %v1538_v35, %v1418_v43 }
 0x2c8   : > { %v1379_v9 = vpop.f32.mrf.mxu1  ;;  %v1710_v28 = vpop.f32.mrf.mxu3 }
 0x2c9   : > { %2020 = vst [vmem:[%s3670_s22 + $0xd0] sm:$0xff] %v1988_v39  ;;  %v1752_v38 = vadd.f32 %v1710_v28, %v1580_v42  ;;  %v1419_v60 = vadd.f32 %v1379_v9, %v3628_v22 }
 0x2cb   : > { %v1921_v61 = vadd.f32 %v1879_v11, %v1752_v38 }
 0x2cd   : > { %v1957_v45 = vadd.f32 %v3658_v7, %v1921_v61 }
 0x2ce   : > { %v1541_v32 = vpop.f32.mrf.mxu2  ;;  %v1882_v44 = vpop.f32.mrf.mxu0 }
 0x2cf   : > { %v1989_v3 = vmax.f32 %v1957_v45, 0.0  ;;  %v1581_v25 = vadd.f32 %v1541_v32, %v1419_v60 }
 0x2d0   : > { %v1382_v13 = vpop.f32.mrf.mxu1  ;;  %v1713_v34 = vpop.f32.mrf.mxu3 }
 0x2d1   : > { %2021 = vst [vmem:[%s3670_s22 + $0xd8] sm:$0xff] %v1989_v3  ;;  %v1753_v54 = vadd.f32 %v1713_v34, %v1581_v25  ;;  %v1420_v36 = vadd.f32 %v1382_v13, %v3635_v30 }
 0x2d3   : > { %v1922_v33 = vadd.f32 %v1882_v44, %v1753_v54 }
 0x2d5   : > { %v1958_v37 = vadd.f32 %v3658_v7, %v1922_v33 }
 0x2d6   : > { %v1544_v8 = vpop.f32.mrf.mxu2  ;;  %v1885_v58 = vpop.f32.mrf.mxu0 }
 0x2d7   : > { %v1990_v22 = vmax.f32 %v1958_v37, 0.0  ;;  %v1582_v21 = vadd.f32 %v1544_v8, %v1420_v36 }
 0x2d8   : > { %v1385_v0 = vpop.f32.mrf.mxu1  ;;  %v1716_v63 = vpop.f32.mrf.mxu3 }
 0x2d9   : > { %2022 = vst [vmem:[%s3670_s22 + $0xe0] sm:$0xff] %v1990_v22  ;;  %v1754_v1 = vadd.f32 %v1716_v63, %v1582_v21  ;;  %v1421_v47 = vadd.f32 %v1385_v0, %v3642_v19 }
 0x2db   : > { %v1923_v59 = vadd.f32 %v1885_v58, %v1754_v1 }
 0x2dd   : > { %v1959_v15 = vadd.f32 %v3658_v7, %v1923_v59 }
 0x2de   : > { %v1547_v23 = vpop.f32.mrf.mxu2  ;;  %v1888_v18 = vpop.f32.mrf.mxu0 }
 0x2df   : > { %v1991_v30 = vmax.f32 %v1959_v15, 0.0  ;;  %v1583_v57 = vadd.f32 %v1547_v23, %v1421_v47 }
 0x2e0   : > { %v1719_v10 = vpop.f32.mrf.mxu3  ;;  %v1388_v52 = vpop.f32.mrf.mxu1 }
 0x2e1   : > { %2023 = vst [vmem:[%s3670_s22 + $0xe8] sm:$0xff] %v1991_v30  ;;  %v1755_v40 = vadd.f32 %v1719_v10, %v1583_v57  ;;  %v1422_v46 = vadd.f32 %v1388_v52, %v3649_v2 }
 0x2e3   : > { %v1924_v14 = vadd.f32 %v1888_v18, %v1755_v40 }
 0x2e5   : > { %v1960_v16 = vadd.f32 %v3658_v7, %v1924_v14 }
 0x2e6   : > { %v1550_v50 = vpop.f32.mrf.mxu2  ;;  %v1891_v41 = vpop.f32.mrf.mxu0 }
 0x2e7   : > { %v1992_v6 = vmax.f32 %v1960_v16, 0.0  ;;  %v1584_v19 = vadd.f32 %v1550_v50, %v1422_v46 }
 0x2e8   : > { %v1722_v12 = vpop.f32.mrf.mxu3 }
 0x2e9   : > { %2024 = vst [vmem:[%s3670_s22 + $0xf0] sm:$0xff] %v1992_v6  ;;  %v1756_v48 = vadd.f32 %v1722_v12, %v1584_v19 }
 0x2eb   : > { %v1925_v62 = vadd.f32 %v1891_v41, %v1756_v48 }
 0x2ed   : > { %v1961_v17 = vadd.f32 %v3658_v7, %v1925_v62 }
 0x2ef   : > { %v1993_v51 = vmax.f32 %v1961_v17, 0.0 }
 0x2f1   : > { %2025 = vst [vmem:[%s3670_s22 + $0xf8] sm:$0xff] %v1993_v51 }
 0x2f2 PF: > { %s13_s12 = sadd.s32 1, %s2315_s12  }
 0x2f3   : > { %p10_p4 = scmp.ge.s32.totalorder %s13_s12, 4  }
 0x2f5   :  { %12 = sbr.rel (!%p10_p4) target bundleno = 1 (0x1), region = 70 }

</bundles_post_ra>
